<compile_context>
chip_gen: v5e
topology: v5e:2x2
jax: 0.10.0
libtpu: 0.0.40
codegen_flags: <defaults>
</compile_context>

<pallas_src>
import numpy as np
import jax
import jax.numpy as jnp
from jax.experimental import pallas as pl
from jax.experimental.pallas import tpu as pltpu

WIN = 7
NP_WIN = WIN * WIN
COV_NORM = NP_WIN / (NP_WIN - 1.0)
C1 = (0.01 * 1.0) ** 2          # data_range == 1 (torch default path)
C2 = (0.03 * 1.0) ** 2
N_PLANES = 10


# ---------------------------------------------------------------------------
# shared elementwise math (used by both the Pallas kernel and the reference)
# ---------------------------------------------------------------------------
def _perp_sum(xr, xi, yr, yi, recip):
    """sum(final_term) of the perpendicular loss term."""
    mag_x = jnp.sqrt(xr * xr + xi * xi)
    mag_y = jnp.sqrt(yr * yr + yi * yi)
    cross = jnp.abs(xr * yi - xi * yr)
    ploss = cross * recip(mag_x + 1e-8)
    # cos(angle(x)-angle(y)) < 0  <=>  Re(x*conj(y)) < 0 for nonzero magnitudes
    aligned = (xr * yr + xi * yi) < 0.0
    final_term = jnp.where(aligned, 2.0 * mag_y - ploss, ploss)
    return jnp.sum(final_term)


def _product_planes(xr, xi, yr, yi):
    """The 10 real planes whose 7x7 box means feed the complex SSIM."""
    return [xr, xi, yr, yi,
            xr * xr - xi * xi, 2.0 * xr * xi,          # x * x
            yr * yr - yi * yi, 2.0 * yr * yi,          # y * y
            xr * yr - xi * yi, xr * yi + xi * yr]      # x * y


def _ssim_sums_from_means(u, recip):
    """(sum Re S, sum Im S) from the 10 box means.

    Denominator (B1,B2 -> D -> 1/|D|^2) is formed first and the numerator
    last, keeping the number of simultaneously-live (OH,OW) temporaries small.
    """
    ux_r, ux_i, uy_r, uy_i, uxx_r, uxx_i, uyy_r, uyy_i, uxy_r, uxy_i = u
    ux2_r = ux_r * ux_r - ux_i * ux_i
    ux2_i = 2.0 * ux_r * ux_i
    uy2_r = uy_r * uy_r - uy_i * uy_i
    uy2_i = 2.0 * uy_r * uy_i
    uxuy_r = ux_r * uy_r - ux_i * uy_i
    uxuy_i = ux_r * uy_i + ux_i * uy_r

    B1_r = ux2_r + uy2_r + C1
    B1_i = ux2_i + uy2_i
    vx_r = COV_NORM * (uxx_r - ux2_r)
    vx_i = COV_NORM * (uxx_i - ux2_i)
    vy_r = COV_NORM * (uyy_r - uy2_r)
    vy_i = COV_NORM * (uyy_i - uy2_i)
    B2_r = vx_r + vy_r + C2
    B2_i = vx_i + vy_i
    D_r = B1_r * B2_r - B1_i * B2_i
    D_i = B1_r * B2_i + B1_i * B2_r
    inv_dd = recip(D_r * D_r + D_i * D_i)

    A1_r = 2.0 * uxuy_r + C1
    A1_i = 2.0 * uxuy_i
    A2_r = 2.0 * COV_NORM * (uxy_r - uxuy_r) + C2     # == 2*vxy + C2
    A2_i = 2.0 * COV_NORM * (uxy_i - uxuy_i)
    N_r = A1_r * A2_r - A1_i * A2_i
    N_i = A1_r * A2_i + A1_i * A2_r

    s_r_sum = jnp.sum((N_r * D_r + N_i * D_i) * inv_dd)
    s_i_sum = jnp.sum((N_i * D_r - N_r * D_i) * inv_dd)
    return s_r_sum, s_i_sum


# ---------------------------------------------------------------------------
# plain-JAX reference (exact f32 shifted-slice box filter)
# ---------------------------------------------------------------------------
def _box_mean_ref(x):
    H, W = x.shape[-2], x.shape[-1]
    OH, OW = H - WIN + 1, W - WIN + 1
    acc = x[..., 0:OH, :]
    for d in range(1, WIN):
        acc = acc + x[..., d:d + OH, :]
    out = acc[..., :, 0:OW]
    for d in range(1, WIN):
        out = out + acc[..., :, d:d + OW]
    return out * (1.0 / NP_WIN)


def reference_loss(x_real, x_imag, y_real, y_imag, param):
    B, C, H, W = x_real.shape
    OH, OW = H - WIN + 1, W - WIN + 1
    sq = lambda a: a.reshape(B, H, W)
    xr, xi, yr, yi = sq(x_real), sq(x_imag), sq(y_real), sq(y_imag)
    recip = lambda v: 1.0 / v

    ft_sum = _perp_sum(xr, xi, yr, yi, recip)
    means = [_box_mean_ref(p) for p in _product_planes(xr, xi, yr, yi)]
    sr, si = _ssim_sums_from_means(means, recip)

    ft_mean = ft_sum / (B * H * W)
    s_r = sr / (B * OH * OW)
    s_i = si / (B * OH * OW)
    p = jnp.clip(param[0], 0.0, 1.0)
    out_r = ft_mean * p + (1.0 - p) * (1.0 - s_r) / B
    out_i = (1.0 - p) * (0.0 - s_i) / B
    return jnp.reshape(out_r + 1j * out_i, (1,)).astype(jnp.complex64)


# ---------------------------------------------------------------------------
# Pallas kernel + wrapper
# ---------------------------------------------------------------------------
def perp_loss_ssim(x_real, x_imag, y_real, y_imag, param):
    """Pallas implementation of PerpLossSSIM.forward. Returns complex64 (1,)."""
    B, C, H, W = x_real.shape
    assert C == 1, "SSIM window has one in/out channel -> inputs must be (B,1,H,W)"
    assert H >= WIN and W >= WIN
    OH, OW = H - WIN + 1, W - WIN + 1
    n_ft = float(B * H * W)
    n_ssim = float(B * OH * OW)
    sq = lambda a: a.reshape(B, H, W)

    # 0/1 banded matrices implementing the separable 7x7 box filter on the MXU.
    # Each band is duplicated along its contraction axis so the f32 -> bf16
    # hi+lo split is folded into ONE matmul per pass (recombined in the f32
    # accumulator); 0/1 entries are exact in bf16, 1/49 applied in f32.
    r_h = np.arange(OH)[:, None]
    c_h = np.arange(H)[None, :]
    band_h = ((c_h >= r_h) & (c_h < r_h + WIN)).astype(np.float32)        # (OH, H)
    band_h2 = jnp.asarray(np.concatenate([band_h, band_h], axis=1),
                          dtype=jnp.bfloat16)                             # (OH, 2H)
    r_w = np.arange(W)[:, None]
    c_w = np.arange(OW)[None, :]
    band_w = ((r_w >= c_w) & (r_w < c_w + WIN)).astype(np.float32)        # (W, OW)
    band_w2 = jnp.asarray(np.concatenate([band_w, band_w], axis=0),
                          dtype=jnp.bfloat16)                             # (2W, OW)

    # VMEM budget: 4 double-buffered input planes + bands + box-filter operands
    # (10-plane lane concat, bf16 hi/lo stack, vertical-pass output) + SSIM tail.
    plane_b = H * W * 4
    boxed_b = OH * OW * 4
    band_b = (OH * 2 * H + 2 * W * OW) * 2
    est = 4 * 2 * plane_b + band_b + 42 * plane_b + 32 * boxed_b
    try:
        vmem_cap = int(pltpu.get_tpu_info().vmem_capacity_bytes)
    except Exception:                       # conservative fallback = v7x size
        vmem_cap = 64 * 2 ** 20
    vmem_limit = int(min(max(2 * est, 32 * 2 ** 20), (3 * vmem_cap) // 4))
    vmem_limit = max(vmem_limit, 16 * 2 ** 20)

    def recip(v):
        # EUP approximate reciprocal + one Newton step (~1e-6 rel error).  The
        # Newton step is mandatory: raw approx (~1e-3) would eat the tolerance.
        r0 = pl.reciprocal(v, approx=True)
        return r0 * (2.0 - v * r0)

    def box_means(planes, bh2, bw2):
        """7x7 'valid' box means of the 10 planes via two banded MXU passes."""
        big = jnp.concatenate(planes, axis=-1)                    # (H, 10W) f32
        hi = big.astype(jnp.bfloat16)
        lo = (big - hi.astype(jnp.float32)).astype(jnp.bfloat16)
        stacked = jnp.concatenate([hi, lo], axis=0)               # (2H, 10W) bf16
        # One batched vertical pass for all 10 planes (hi/lo fused into K=2H).
        vert = jnp.dot(bh2, stacked,
                       preferred_element_type=jnp.float32)        # (OH, 10W) f32
        outs = []
        for idx in range(N_PLANES):
            t = vert[:, idx * W:(idx + 1) * W]                    # (OH, W) f32
            thi = t.astype(jnp.bfloat16)
            tlo = (t - thi.astype(jnp.float32)).astype(jnp.bfloat16)
            th = jnp.concatenate([thi, tlo], axis=-1)             # (OH, 2W) bf16
            s = jnp.dot(th, bw2, preferred_element_type=jnp.float32)  # (OH, OW)
            outs.append(s * (1.0 / NP_WIN))
        return outs

    def kernel(param_ref, xr_ref, xi_ref, yr_ref, yi_ref, bh_ref, bw_ref,
               out_r_ref, out_i_ref, acc_ft, acc_sr, acc_si):
        b = pl.program_id(0)

        @pl.when(b == 0)
        def _init():
            acc_ft[...] = jnp.zeros_like(acc_ft)
            acc_sr[...] = jnp.zeros_like(acc_sr)
            acc_si[...] = jnp.zeros_like(acc_si)

        xr = xr_ref[...]
        xi = xi_ref[...]
        yr = yr_ref[...]
        yi = yi_ref[...]

        ft_s = _perp_sum(xr, xi, yr, yi, recip)
        means = box_means(_product_planes(xr, xi, yr, yi),
                          bh_ref[...], bw_ref[...])
        sr_s, si_s = _ssim_sums_from_means(means, recip)

        acc_ft[...] = acc_ft[...] + jnp.broadcast_to(ft_s, (1, 1))
        acc_sr[...] = acc_sr[...] + jnp.broadcast_to(sr_s, (1, 1))
        acc_si[...] = acc_si[...] + jnp.broadcast_to(si_s, (1, 1))

        @pl.when(b == B - 1)
        def _finalize():
            p = jnp.clip(param_ref[0], 0.0, 1.0)
            ft_mean = acc_ft[...] * (1.0 / n_ft)       # mean over B*H*W
            s_r = acc_sr[...] * (1.0 / n_ssim)         # mean over B*OH*OW
            s_i = acc_si[...] * (1.0 / n_ssim)
            ssim_r = (1.0 - s_r) * (1.0 / B)
            ssim_i = (0.0 - s_i) * (1.0 / B)
            out_r_ref[...] = ft_mean * p + (1.0 - p) * ssim_r
            out_i_ref[...] = (1.0 - p) * ssim_i

    def plane_spec():
        return pl.BlockSpec((None, H, W), lambda b: (b, 0, 0))

    grid_spec = pltpu.PrefetchScalarGridSpec(
        num_scalar_prefetch=0,
        grid=(B,),
        in_specs=[
            pl.BlockSpec(memory_space=pltpu.MemorySpace.SMEM),   # param (1,)
            plane_spec(),                                        # x real
            plane_spec(),                                        # x imag
            plane_spec(),                                        # y real
            plane_spec(),                                        # y imag
            pl.BlockSpec(memory_space=pltpu.MemorySpace.VMEM),   # band_h2 (resident)
            pl.BlockSpec(memory_space=pltpu.MemorySpace.VMEM),   # band_w2 (resident)
        ],
        out_specs=(pl.BlockSpec((1, 1), lambda b: (0, 0)),
                   pl.BlockSpec((1, 1), lambda b: (0, 0))),
        scratch_shapes=[pltpu.VMEM((1, 1), jnp.float32),
                        pltpu.VMEM((1, 1), jnp.float32),
                        pltpu.VMEM((1, 1), jnp.float32)],
    )

    out_r, out_i = pl.pallas_call(
        kernel,
        out_shape=(jax.ShapeDtypeStruct((1, 1), jnp.float32),
                   jax.ShapeDtypeStruct((1, 1), jnp.float32)),
        grid_spec=grid_spec,
        compiler_params=pltpu.CompilerParams(
            # batch axis reduces into the accumulators -> "arbitrary"
            dimension_semantics=("arbitrary",),
            vmem_limit_bytes=vmem_limit),
    )(param, sq(x_real), sq(x_imag), sq(y_real), sq(y_imag), band_h2, band_w2)

    loss = out_r[0, 0] + 1j * out_i[0, 0]
    return jnp.reshape(loss, (1,)).astype(jnp.complex64)


if __name__ == "__main__":
    key = jax.random.PRNGKey(0)
    k1, k2, k3, k4 = jax.random.split(key, 4)
    B, C, H, W = 2, 1, 16, 16

    x_real = jax.random.normal(k1, (B, C, H, W), jnp.float32)
    x_imag = jax.random.normal(k2, (B, C, H, W), jnp.float32)
    y_real = jax.random.normal(k3, (B, C, H, W), jnp.float32)
    y_imag = jax.random.normal(k4, (B, C, H, W), jnp.float32)
    # deterministic parameter init, matching nn.Parameter(torch.ones(1) / 2)
    param = jnp.full((1,), 0.5, dtype=jnp.float32)

    loss = jax.block_until_ready(perp_loss_ssim(x_real, x_imag, y_real, y_imag, param))
    ref = jax.block_until_ready(reference_loss(x_real, x_imag, y_real, y_imag, param))
    np.testing.assert_allclose(np.asarray(loss), np.asarray(ref), rtol=1e-3, atol=1e-5)

    print("KERNEL_OK")
</pallas_src>

<mosaic_0001>
module attributes {stable_mosaic.version = 11 : i64} {
  func.func @kernel(%arg0: i32, %arg1: memref<1xf32, #tpu.memory_space<smem>>, %arg2: memref<1x16x16xf32, #tpu.memory_space<vmem>>, %arg3: memref<1x16x16xf32, #tpu.memory_space<vmem>>, %arg4: memref<1x16x16xf32, #tpu.memory_space<vmem>>, %arg5: memref<1x16x16xf32, #tpu.memory_space<vmem>>, %arg6: memref<10x32xbf16, #tpu.memory_space<vmem>>, %arg7: memref<32x10xbf16, #tpu.memory_space<vmem>>, %arg8: memref<1x1xf32, #tpu.memory_space<vmem>>, %arg9: memref<1x1xf32, #tpu.memory_space<vmem>>, %arg10: memref<1x1xf32, #tpu.memory_space<vmem>>, %arg11: memref<1x1xf32, #tpu.memory_space<vmem>>, %arg12: memref<1x1xf32, #tpu.memory_space<vmem>>) attributes {dimension_semantics = [#tpu.dimension_semantics<arbitrary>], iteration_bounds = array<i64: 2>, scalar_prefetch = 0 : i64, scratch_operands = 3 : i64, tpu.core_type = #tpu.core_type<tc>, window_params = [{transform_indices = @transform_0, window_bounds = array<i64: 1>}, {transform_indices = @transform_1, window_bounds = array<i64: 1, 16, 16>}, {transform_indices = @transform_2, window_bounds = array<i64: 1, 16, 16>}, {transform_indices = @transform_3, window_bounds = array<i64: 1, 16, 16>}, {transform_indices = @transform_4, window_bounds = array<i64: 1, 16, 16>}, {pipeline_mode = #tpu.pipeline_mode<synchronous>, transform_indices = @transform_5, window_bounds = array<i64: 10, 32>}, {pipeline_mode = #tpu.pipeline_mode<synchronous>, transform_indices = @transform_6, window_bounds = array<i64: 32, 10>}, {pipeline_mode = #tpu.pipeline_mode<synchronous>, transform_indices = @transform_7, window_bounds = array<i64: 1, 1>}, {pipeline_mode = #tpu.pipeline_mode<synchronous>, transform_indices = @transform_8, window_bounds = array<i64: 1, 1>}]} {
    %c0_i32 = arith.constant 0 : i32
    %0 = arith.cmpi eq, %arg0, %c0_i32 : i32
    %1 = arith.extui %0 : i1 to i32
    %c0_i32_0 = arith.constant 0 : i32
    %2 = arith.cmpi ne, %1, %c0_i32_0 : i32
    scf.if %2 {
      %cst_73 = arith.constant 0.000000e+00 : f32
      %264 = vector.broadcast %cst_73 : f32 to vector<1x1xf32>
      %c0_74 = arith.constant 0 : index
      %c0_75 = arith.constant 0 : index
      %265 = vector.load %arg10[%c0_74, %c0_75] : memref<1x1xf32, #tpu.memory_space<vmem>>, vector<1x1xf32>
      tpu.vector_store %arg10[%c0_74, %c0_75], %264 {strides = array<i32>} : memref<1x1xf32, #tpu.memory_space<vmem>>, vector<1x1xf32>,
      %cst_76 = arith.constant 0.000000e+00 : f32
      %266 = vector.broadcast %cst_76 : f32 to vector<1x1xf32>
      %c0_77 = arith.constant 0 : index
      %c0_78 = arith.constant 0 : index
      %267 = vector.load %arg11[%c0_77, %c0_78] : memref<1x1xf32, #tpu.memory_space<vmem>>, vector<1x1xf32>
      tpu.vector_store %arg11[%c0_77, %c0_78], %266 {strides = array<i32>} : memref<1x1xf32, #tpu.memory_space<vmem>>, vector<1x1xf32>,
      %cst_79 = arith.constant 0.000000e+00 : f32
      %268 = vector.broadcast %cst_79 : f32 to vector<1x1xf32>
      %c0_80 = arith.constant 0 : index
      %c0_81 = arith.constant 0 : index
      %269 = vector.load %arg12[%c0_80, %c0_81] : memref<1x1xf32, #tpu.memory_space<vmem>>, vector<1x1xf32>
      tpu.vector_store %arg12[%c0_80, %c0_81], %268 {strides = array<i32>} : memref<1x1xf32, #tpu.memory_space<vmem>>, vector<1x1xf32>,
    } else {
    }
    %c0 = arith.constant 0 : index
    %c0_1 = arith.constant 0 : index
    %c0_2 = arith.constant 0 : index
    %3 = vector.load %arg2[%c0, %c0_1, %c0_2] : memref<1x16x16xf32, #tpu.memory_space<vmem>>, vector<1x16x16xf32>
    %4 = vector.shape_cast %3 : vector<1x16x16xf32> to vector<16x16xf32>
    %c0_3 = arith.constant 0 : index
    %c0_4 = arith.constant 0 : index
    %c0_5 = arith.constant 0 : index
    %5 = vector.load %arg3[%c0_3, %c0_4, %c0_5] : memref<1x16x16xf32, #tpu.memory_space<vmem>>, vector<1x16x16xf32>
    %6 = vector.shape_cast %5 : vector<1x16x16xf32> to vector<16x16xf32>
    %c0_6 = arith.constant 0 : index
    %c0_7 = arith.constant 0 : index
    %c0_8 = arith.constant 0 : index
    %7 = vector.load %arg4[%c0_6, %c0_7, %c0_8] : memref<1x16x16xf32, #tpu.memory_space<vmem>>, vector<1x16x16xf32>
    %8 = vector.shape_cast %7 : vector<1x16x16xf32> to vector<16x16xf32>
    %c0_9 = arith.constant 0 : index
    %c0_10 = arith.constant 0 : index
    %c0_11 = arith.constant 0 : index
    %9 = vector.load %arg5[%c0_9, %c0_10, %c0_11] : memref<1x16x16xf32, #tpu.memory_space<vmem>>, vector<1x16x16xf32>
    %10 = vector.shape_cast %9 : vector<1x16x16xf32> to vector<16x16xf32>
    %11 = arith.mulf %4, %4 : vector<16x16xf32>
    %12 = arith.mulf %6, %6 : vector<16x16xf32>
    %13 = arith.addf %11, %12 : vector<16x16xf32>
    %14 = math.sqrt %13 : vector<16x16xf32>
    %15 = arith.mulf %8, %8 : vector<16x16xf32>
    %16 = arith.mulf %10, %10 : vector<16x16xf32>
    %17 = arith.addf %15, %16 : vector<16x16xf32>
    %18 = math.sqrt %17 : vector<16x16xf32>
    %19 = arith.mulf %4, %10 : vector<16x16xf32>
    %20 = arith.mulf %6, %8 : vector<16x16xf32>
    %21 = arith.subf %19, %20 : vector<16x16xf32>
    %22 = math.absf %21 : vector<16x16xf32>
    %cst = arith.constant 9.99999993E-9 : f32
    %23 = vector.broadcast %cst : f32 to vector<16x16xf32>
    %24 = arith.addf %14, %23 : vector<16x16xf32>
    %25 = tpu.reciprocal %24 {approx = true} : vector<16x16xf32> -> vector<16x16xf32>
    %26 = arith.mulf %24, %25 : vector<16x16xf32>
    %cst_12 = arith.constant 2.000000e+00 : f32
    %27 = vector.broadcast %cst_12 : f32 to vector<16x16xf32>
    %28 = arith.subf %27, %26 : vector<16x16xf32>
    %29 = arith.mulf %25, %28 : vector<16x16xf32>
    %30 = arith.mulf %22, %29 : vector<16x16xf32>
    %31 = arith.mulf %4, %8 : vector<16x16xf32>
    %32 = arith.mulf %6, %10 : vector<16x16xf32>
    %33 = arith.addf %31, %32 : vector<16x16xf32>
    %cst_13 = arith.constant 0.000000e+00 : f32
    %34 = vector.broadcast %cst_13 : f32 to vector<16x16xf32>
    %35 = arith.cmpf olt, %33, %34 : vector<16x16xf32>
    %cst_14 = arith.constant 2.000000e+00 : f32
    %36 = vector.broadcast %cst_14 : f32 to vector<16x16xf32>
    %37 = arith.mulf %36, %18 : vector<16x16xf32>
    %38 = arith.subf %37, %30 : vector<16x16xf32>
    %39 = arith.select %35, %38, %30 : vector<16x16xi1>, vector<16x16xf32>
    %40 = vector.shape_cast %39 : vector<16x16xf32> to vector<1x16x16xf32>
    %cst_15 = arith.constant dense<0.000000e+00> : vector<1xf32>
    %41 = vector.multi_reduction <add>, %40, %cst_15 [1, 2] : vector<1x16x16xf32> to vector<1xf32>
    %42 = vector.shape_cast %41 : vector<1xf32> to vector<1x1x1xf32>
    %43 = vector.extract %42[0, 0, 0] : f32 from vector<1x1x1xf32>
    %44 = arith.mulf %4, %4 : vector<16x16xf32>
    %45 = arith.mulf %6, %6 : vector<16x16xf32>
    %46 = arith.subf %44, %45 : vector<16x16xf32>
    %cst_16 = arith.constant 2.000000e+00 : f32
    %47 = vector.broadcast %cst_16 : f32 to vector<16x16xf32>
    %48 = arith.mulf %47, %4 : vector<16x16xf32>
    %49 = arith.mulf %48, %6 : vector<16x16xf32>
    %50 = arith.mulf %8, %8 : vector<16x16xf32>
    %51 = arith.mulf %10, %10 : vector<16x16xf32>
    %52 = arith.subf %50, %51 : vector<16x16xf32>
    %cst_17 = arith.constant 2.000000e+00 : f32
    %53 = vector.broadcast %cst_17 : f32 to vector<16x16xf32>
    %54 = arith.mulf %53, %8 : vector<16x16xf32>
    %55 = arith.mulf %54, %10 : vector<16x16xf32>
    %56 = arith.mulf %4, %8 : vector<16x16xf32>
    %57 = arith.mulf %6, %10 : vector<16x16xf32>
    %58 = arith.subf %56, %57 : vector<16x16xf32>
    %59 = arith.mulf %4, %10 : vector<16x16xf32>
    %60 = arith.mulf %6, %8 : vector<16x16xf32>
    %61 = arith.addf %59, %60 : vector<16x16xf32>
    %c0_18 = arith.constant 0 : index
    %c0_19 = arith.constant 0 : index
    %62 = vector.load %arg6[%c0_18, %c0_19] : memref<10x32xbf16, #tpu.memory_space<vmem>>, vector<10x32xbf16>
    %c0_20 = arith.constant 0 : index
    %c0_21 = arith.constant 0 : index
    %63 = vector.load %arg7[%c0_20, %c0_21] : memref<32x10xbf16, #tpu.memory_space<vmem>>, vector<32x10xbf16>
    %64 = tpu.concatenate %4, %6, %8, %10, %46, %49, %52, %55, %58, %61 in 1 : vector<16x16xf32>, vector<16x16xf32>, vector<16x16xf32>, vector<16x16xf32>, vector<16x16xf32>, vector<16x16xf32>, vector<16x16xf32>, vector<16x16xf32>, vector<16x16xf32>, vector<16x16xf32> -> vector<16x160xf32>
    %65 = arith.truncf %64 : vector<16x160xf32> to vector<16x160xbf16>
    %66 = arith.extf %65 : vector<16x160xbf16> to vector<16x160xf32>
    %67 = arith.subf %64, %66 : vector<16x160xf32>
    %68 = arith.truncf %67 : vector<16x160xf32> to vector<16x160xbf16>
    %69 = tpu.concatenate %65, %68 in 0 : vector<16x160xbf16>, vector<16x160xbf16> -> vector<32x160xbf16>
    %cst_22 = arith.constant dense<0.000000e+00> : vector<10x160xf32>
    %70 = tpu.matmul %62, %69, %cst_22 {dimension_numbers = #tpu.dot_dimension_numbers<[1], [0], [0], [1], [0, 0, 1, 1], [], []>} : vector<10x32xbf16>, vector<32x160xbf16>, vector<10x160xf32> -> vector<10x160xf32>
    %71 = vector.extract_strided_slice %70 {offsets = [0, 0], sizes = [10, 16], strides = [1, 1]} : vector<10x160xf32> to vector<10x16xf32>
    %72 = arith.truncf %71 : vector<10x16xf32> to vector<10x16xbf16>
    %73 = arith.extf %72 : vector<10x16xbf16> to vector<10x16xf32>
    %74 = arith.subf %71, %73 : vector<10x16xf32>
    %75 = arith.truncf %74 : vector<10x16xf32> to vector<10x16xbf16>
    %76 = tpu.concatenate %72, %75 in 1 : vector<10x16xbf16>, vector<10x16xbf16> -> vector<10x32xbf16>
    %cst_23 = arith.constant dense<0.000000e+00> : vector<10x10xf32>
    %77 = tpu.matmul %76, %63, %cst_23 {dimension_numbers = #tpu.dot_dimension_numbers<[1], [0], [0], [1], [0, 0, 1, 1], [], []>} : vector<10x32xbf16>, vector<32x10xbf16>, vector<10x10xf32> -> vector<10x10xf32>
    %cst_24 = arith.constant 0.0204081628 : f32
    %78 = vector.broadcast %cst_24 : f32 to vector<10x10xf32>
    %79 = arith.mulf %77, %78 : vector<10x10xf32>
    %80 = vector.extract_strided_slice %70 {offsets = [0, 16], sizes = [10, 16], strides = [1, 1]} : vector<10x160xf32> to vector<10x16xf32>
    %81 = arith.truncf %80 : vector<10x16xf32> to vector<10x16xbf16>
    %82 = arith.extf %81 : vector<10x16xbf16> to vector<10x16xf32>
    %83 = arith.subf %80, %82 : vector<10x16xf32>
    %84 = arith.truncf %83 : vector<10x16xf32> to vector<10x16xbf16>
    %85 = tpu.concatenate %81, %84 in 1 : vector<10x16xbf16>, vector<10x16xbf16> -> vector<10x32xbf16>
    %cst_25 = arith.constant dense<0.000000e+00> : vector<10x10xf32>
    %86 = tpu.matmul %85, %63, %cst_25 {dimension_numbers = #tpu.dot_dimension_numbers<[1], [0], [0], [1], [0, 0, 1, 1], [], []>} : vector<10x32xbf16>, vector<32x10xbf16>, vector<10x10xf32> -> vector<10x10xf32>
    %cst_26 = arith.constant 0.0204081628 : f32
    %87 = vector.broadcast %cst_26 : f32 to vector<10x10xf32>
    %88 = arith.mulf %86, %87 : vector<10x10xf32>
    %89 = vector.extract_strided_slice %70 {offsets = [0, 32], sizes = [10, 16], strides = [1, 1]} : vector<10x160xf32> to vector<10x16xf32>
    %90 = arith.truncf %89 : vector<10x16xf32> to vector<10x16xbf16>
    %91 = arith.extf %90 : vector<10x16xbf16> to vector<10x16xf32>
    %92 = arith.subf %89, %91 : vector<10x16xf32>
    %93 = arith.truncf %92 : vector<10x16xf32> to vector<10x16xbf16>
    %94 = tpu.concatenate %90, %93 in 1 : vector<10x16xbf16>, vector<10x16xbf16> -> vector<10x32xbf16>
    %cst_27 = arith.constant dense<0.000000e+00> : vector<10x10xf32>
    %95 = tpu.matmul %94, %63, %cst_27 {dimension_numbers = #tpu.dot_dimension_numbers<[1], [0], [0], [1], [0, 0, 1, 1], [], []>} : vector<10x32xbf16>, vector<32x10xbf16>, vector<10x10xf32> -> vector<10x10xf32>
    %cst_28 = arith.constant 0.0204081628 : f32
    %96 = vector.broadcast %cst_28 : f32 to vector<10x10xf32>
    %97 = arith.mulf %95, %96 : vector<10x10xf32>
    %98 = vector.extract_strided_slice %70 {offsets = [0, 48], sizes = [10, 16], strides = [1, 1]} : vector<10x160xf32> to vector<10x16xf32>
    %99 = arith.truncf %98 : vector<10x16xf32> to vector<10x16xbf16>
    %100 = arith.extf %99 : vector<10x16xbf16> to vector<10x16xf32>
    %101 = arith.subf %98, %100 : vector<10x16xf32>
    %102 = arith.truncf %101 : vector<10x16xf32> to vector<10x16xbf16>
    %103 = tpu.concatenate %99, %102 in 1 : vector<10x16xbf16>, vector<10x16xbf16> -> vector<10x32xbf16>
    %cst_29 = arith.constant dense<0.000000e+00> : vector<10x10xf32>
    %104 = tpu.matmul %103, %63, %cst_29 {dimension_numbers = #tpu.dot_dimension_numbers<[1], [0], [0], [1], [0, 0, 1, 1], [], []>} : vector<10x32xbf16>, vector<32x10xbf16>, vector<10x10xf32> -> vector<10x10xf32>
    %cst_30 = arith.constant 0.0204081628 : f32
    %105 = vector.broadcast %cst_30 : f32 to vector<10x10xf32>
    %106 = arith.mulf %104, %105 : vector<10x10xf32>
    %107 = vector.extract_strided_slice %70 {offsets = [0, 64], sizes = [10, 16], strides = [1, 1]} : vector<10x160xf32> to vector<10x16xf32>
    %108 = arith.truncf %107 : vector<10x16xf32> to vector<10x16xbf16>
    %109 = arith.extf %108 : vector<10x16xbf16> to vector<10x16xf32>
    %110 = arith.subf %107, %109 : vector<10x16xf32>
    %111 = arith.truncf %110 : vector<10x16xf32> to vector<10x16xbf16>
    %112 = tpu.concatenate %108, %111 in 1 : vector<10x16xbf16>, vector<10x16xbf16> -> vector<10x32xbf16>
    %cst_31 = arith.constant dense<0.000000e+00> : vector<10x10xf32>
    %113 = tpu.matmul %112, %63, %cst_31 {dimension_numbers = #tpu.dot_dimension_numbers<[1], [0], [0], [1], [0, 0, 1, 1], [], []>} : vector<10x32xbf16>, vector<32x10xbf16>, vector<10x10xf32> -> vector<10x10xf32>
    %cst_32 = arith.constant 0.0204081628 : f32
    %114 = vector.broadcast %cst_32 : f32 to vector<10x10xf32>
    %115 = arith.mulf %113, %114 : vector<10x10xf32>
    %116 = vector.extract_strided_slice %70 {offsets = [0, 80], sizes = [10, 16], strides = [1, 1]} : vector<10x160xf32> to vector<10x16xf32>
    %117 = arith.truncf %116 : vector<10x16xf32> to vector<10x16xbf16>
    %118 = arith.extf %117 : vector<10x16xbf16> to vector<10x16xf32>
    %119 = arith.subf %116, %118 : vector<10x16xf32>
    %120 = arith.truncf %119 : vector<10x16xf32> to vector<10x16xbf16>
    %121 = tpu.concatenate %117, %120 in 1 : vector<10x16xbf16>, vector<10x16xbf16> -> vector<10x32xbf16>
    %cst_33 = arith.constant dense<0.000000e+00> : vector<10x10xf32>
    %122 = tpu.matmul %121, %63, %cst_33 {dimension_numbers = #tpu.dot_dimension_numbers<[1], [0], [0], [1], [0, 0, 1, 1], [], []>} : vector<10x32xbf16>, vector<32x10xbf16>, vector<10x10xf32> -> vector<10x10xf32>
    %cst_34 = arith.constant 0.0204081628 : f32
    %123 = vector.broadcast %cst_34 : f32 to vector<10x10xf32>
    %124 = arith.mulf %122, %123 : vector<10x10xf32>
    %125 = vector.extract_strided_slice %70 {offsets = [0, 96], sizes = [10, 16], strides = [1, 1]} : vector<10x160xf32> to vector<10x16xf32>
    %126 = arith.truncf %125 : vector<10x16xf32> to vector<10x16xbf16>
    %127 = arith.extf %126 : vector<10x16xbf16> to vector<10x16xf32>
    %128 = arith.subf %125, %127 : vector<10x16xf32>
    %129 = arith.truncf %128 : vector<10x16xf32> to vector<10x16xbf16>
    %130 = tpu.concatenate %126, %129 in 1 : vector<10x16xbf16>, vector<10x16xbf16> -> vector<10x32xbf16>
    %cst_35 = arith.constant dense<0.000000e+00> : vector<10x10xf32>
    %131 = tpu.matmul %130, %63, %cst_35 {dimension_numbers = #tpu.dot_dimension_numbers<[1], [0], [0], [1], [0, 0, 1, 1], [], []>} : vector<10x32xbf16>, vector<32x10xbf16>, vector<10x10xf32> -> vector<10x10xf32>
    %cst_36 = arith.constant 0.0204081628 : f32
    %132 = vector.broadcast %cst_36 : f32 to vector<10x10xf32>
    %133 = arith.mulf %131, %132 : vector<10x10xf32>
    %134 = vector.extract_strided_slice %70 {offsets = [0, 112], sizes = [10, 16], strides = [1, 1]} : vector<10x160xf32> to vector<10x16xf32>
    %135 = arith.truncf %134 : vector<10x16xf32> to vector<10x16xbf16>
    %136 = arith.extf %135 : vector<10x16xbf16> to vector<10x16xf32>
    %137 = arith.subf %134, %136 : vector<10x16xf32>
    %138 = arith.truncf %137 : vector<10x16xf32> to vector<10x16xbf16>
    %139 = tpu.concatenate %135, %138 in 1 : vector<10x16xbf16>, vector<10x16xbf16> -> vector<10x32xbf16>
    %cst_37 = arith.constant dense<0.000000e+00> : vector<10x10xf32>
    %140 = tpu.matmul %139, %63, %cst_37 {dimension_numbers = #tpu.dot_dimension_numbers<[1], [0], [0], [1], [0, 0, 1, 1], [], []>} : vector<10x32xbf16>, vector<32x10xbf16>, vector<10x10xf32> -> vector<10x10xf32>
    %cst_38 = arith.constant 0.0204081628 : f32
    %141 = vector.broadcast %cst_38 : f32 to vector<10x10xf32>
    %142 = arith.mulf %140, %141 : vector<10x10xf32>
    %143 = vector.extract_strided_slice %70 {offsets = [0, 128], sizes = [10, 16], strides = [1, 1]} : vector<10x160xf32> to vector<10x16xf32>
    %144 = arith.truncf %143 : vector<10x16xf32> to vector<10x16xbf16>
    %145 = arith.extf %144 : vector<10x16xbf16> to vector<10x16xf32>
    %146 = arith.subf %143, %145 : vector<10x16xf32>
    %147 = arith.truncf %146 : vector<10x16xf32> to vector<10x16xbf16>
    %148 = tpu.concatenate %144, %147 in 1 : vector<10x16xbf16>, vector<10x16xbf16> -> vector<10x32xbf16>
    %cst_39 = arith.constant dense<0.000000e+00> : vector<10x10xf32>
    %149 = tpu.matmul %148, %63, %cst_39 {dimension_numbers = #tpu.dot_dimension_numbers<[1], [0], [0], [1], [0, 0, 1, 1], [], []>} : vector<10x32xbf16>, vector<32x10xbf16>, vector<10x10xf32> -> vector<10x10xf32>
    %cst_40 = arith.constant 0.0204081628 : f32
    %150 = vector.broadcast %cst_40 : f32 to vector<10x10xf32>
    %151 = arith.mulf %149, %150 : vector<10x10xf32>
    %152 = vector.extract_strided_slice %70 {offsets = [0, 144], sizes = [10, 16], strides = [1, 1]} : vector<10x160xf32> to vector<10x16xf32>
    %153 = arith.truncf %152 : vector<10x16xf32> to vector<10x16xbf16>
    %154 = arith.extf %153 : vector<10x16xbf16> to vector<10x16xf32>
    %155 = arith.subf %152, %154 : vector<10x16xf32>
    %156 = arith.truncf %155 : vector<10x16xf32> to vector<10x16xbf16>
    %157 = tpu.concatenate %153, %156 in 1 : vector<10x16xbf16>, vector<10x16xbf16> -> vector<10x32xbf16>
    %cst_41 = arith.constant dense<0.000000e+00> : vector<10x10xf32>
    %158 = tpu.matmul %157, %63, %cst_41 {dimension_numbers = #tpu.dot_dimension_numbers<[1], [0], [0], [1], [0, 0, 1, 1], [], []>} : vector<10x32xbf16>, vector<32x10xbf16>, vector<10x10xf32> -> vector<10x10xf32>
    %cst_42 = arith.constant 0.0204081628 : f32
    %159 = vector.broadcast %cst_42 : f32 to vector<10x10xf32>
    %160 = arith.mulf %158, %159 : vector<10x10xf32>
    %161 = arith.mulf %79, %79 : vector<10x10xf32>
    %162 = arith.mulf %88, %88 : vector<10x10xf32>
    %163 = arith.subf %161, %162 : vector<10x10xf32>
    %cst_43 = arith.constant 2.000000e+00 : f32
    %164 = vector.broadcast %cst_43 : f32 to vector<10x10xf32>
    %165 = arith.mulf %164, %79 : vector<10x10xf32>
    %166 = arith.mulf %165, %88 : vector<10x10xf32>
    %167 = arith.mulf %97, %97 : vector<10x10xf32>
    %168 = arith.mulf %106, %106 : vector<10x10xf32>
    %169 = arith.subf %167, %168 : vector<10x10xf32>
    %cst_44 = arith.constant 2.000000e+00 : f32
    %170 = vector.broadcast %cst_44 : f32 to vector<10x10xf32>
    %171 = arith.mulf %170, %97 : vector<10x10xf32>
    %172 = arith.mulf %171, %106 : vector<10x10xf32>
    %173 = arith.mulf %79, %97 : vector<10x10xf32>
    %174 = arith.mulf %88, %106 : vector<10x10xf32>
    %175 = arith.subf %173, %174 : vector<10x10xf32>
    %176 = arith.mulf %79, %106 : vector<10x10xf32>
    %177 = arith.mulf %88, %97 : vector<10x10xf32>
    %178 = arith.addf %176, %177 : vector<10x10xf32>
    %179 = arith.addf %163, %169 : vector<10x10xf32>
    %cst_45 = arith.constant 9.99999974E-5 : f32
    %180 = vector.broadcast %cst_45 : f32 to vector<10x10xf32>
    %181 = arith.addf %179, %180 : vector<10x10xf32>
    %182 = arith.addf %166, %172 : vector<10x10xf32>
    %183 = arith.subf %115, %163 : vector<10x10xf32>
    %cst_46 = arith.constant 1.02083337 : f32
    %184 = vector.broadcast %cst_46 : f32 to vector<10x10xf32>
    %185 = arith.mulf %184, %183 : vector<10x10xf32>
    %186 = arith.subf %124, %166 : vector<10x10xf32>
    %cst_47 = arith.constant 1.02083337 : f32
    %187 = vector.broadcast %cst_47 : f32 to vector<10x10xf32>
    %188 = arith.mulf %187, %186 : vector<10x10xf32>
    %189 = arith.subf %133, %169 : vector<10x10xf32>
    %cst_48 = arith.constant 1.02083337 : f32
    %190 = vector.broadcast %cst_48 : f32 to vector<10x10xf32>
    %191 = arith.mulf %190, %189 : vector<10x10xf32>
    %192 = arith.subf %142, %172 : vector<10x10xf32>
    %cst_49 = arith.constant 1.02083337 : f32
    %193 = vector.broadcast %cst_49 : f32 to vector<10x10xf32>
    %194 = arith.mulf %193, %192 : vector<10x10xf32>
    %195 = arith.addf %185, %191 : vector<10x10xf32>
    %cst_50 = arith.constant 8.99999984E-4 : f32
    %196 = vector.broadcast %cst_50 : f32 to vector<10x10xf32>
    %197 = arith.addf %195, %196 : vector<10x10xf32>
    %198 = arith.addf %188, %194 : vector<10x10xf32>
    %199 = arith.mulf %181, %197 : vector<10x10xf32>
    %200 = arith.mulf %182, %198 : vector<10x10xf32>
    %201 = arith.subf %199, %200 : vector<10x10xf32>
    %202 = arith.mulf %181, %198 : vector<10x10xf32>
    %203 = arith.mulf %182, %197 : vector<10x10xf32>
    %204 = arith.addf %202, %203 : vector<10x10xf32>
    %205 = arith.mulf %201, %201 : vector<10x10xf32>
    %206 = arith.mulf %204, %204 : vector<10x10xf32>
    %207 = arith.addf %205, %206 : vector<10x10xf32>
    %208 = tpu.reciprocal %207 {approx = true} : vector<10x10xf32> -> vector<10x10xf32>
    %209 = arith.mulf %207, %208 : vector<10x10xf32>
    %cst_51 = arith.constant 2.000000e+00 : f32
    %210 = vector.broadcast %cst_51 : f32 to vector<10x10xf32>
    %211 = arith.subf %210, %209 : vector<10x10xf32>
    %212 = arith.mulf %208, %211 : vector<10x10xf32>
    %cst_52 = arith.constant 2.000000e+00 : f32
    %213 = vector.broadcast %cst_52 : f32 to vector<10x10xf32>
    %214 = arith.mulf %213, %175 : vector<10x10xf32>
    %cst_53 = arith.constant 9.99999974E-5 : f32
    %215 = vector.broadcast %cst_53 : f32 to vector<10x10xf32>
    %216 = arith.addf %214, %215 : vector<10x10xf32>
    %cst_54 = arith.constant 2.000000e+00 : f32
    %217 = vector.broadcast %cst_54 : f32 to vector<10x10xf32>
    %218 = arith.mulf %217, %178 : vector<10x10xf32>
    %219 = arith.subf %151, %175 : vector<10x10xf32>
    %cst_55 = arith.constant 2.04166675 : f32
    %220 = vector.broadcast %cst_55 : f32 to vector<10x10xf32>
    %221 = arith.mulf %220, %219 : vector<10x10xf32>
    %cst_56 = arith.constant 8.99999984E-4 : f32
    %222 = vector.broadcast %cst_56 : f32 to vector<10x10xf32>
    %223 = arith.addf %221, %222 : vector<10x10xf32>
    %224 = arith.subf %160, %178 : vector<10x10xf32>
    %cst_57 = arith.constant 2.04166675 : f32
    %225 = vector.broadcast %cst_57 : f32 to vector<10x10xf32>
    %226 = arith.mulf %225, %224 : vector<10x10xf32>
    %227 = arith.mulf %216, %223 : vector<10x10xf32>
    %228 = arith.mulf %218, %226 : vector<10x10xf32>
    %229 = arith.subf %227, %228 : vector<10x10xf32>
    %230 = arith.mulf %216, %226 : vector<10x10xf32>
    %231 = arith.mulf %218, %223 : vector<10x10xf32>
    %232 = arith.addf %230, %231 : vector<10x10xf32>
    %233 = arith.mulf %229, %201 : vector<10x10xf32>
    %234 = arith.mulf %232, %204 : vector<10x10xf32>
    %235 = arith.addf %233, %234 : vector<10x10xf32>
    %236 = arith.mulf %235, %212 : vector<10x10xf32>
    %237 = vector.shape_cast %236 : vector<10x10xf32> to vector<1x10x10xf32>
    %cst_58 = arith.constant dense<0.000000e+00> : vector<1xf32>
    %238 = vector.multi_reduction <add>, %237, %cst_58 [1, 2] : vector<1x10x10xf32> to vector<1xf32>
    %239 = vector.shape_cast %238 : vector<1xf32> to vector<1x1x1xf32>
    %240 = vector.extract %239[0, 0, 0] : f32 from vector<1x1x1xf32>
    %241 = arith.mulf %232, %201 : vector<10x10xf32>
    %242 = arith.mulf %229, %204 : vector<10x10xf32>
    %243 = arith.subf %241, %242 : vector<10x10xf32>
    %244 = arith.mulf %243, %212 : vector<10x10xf32>
    %245 = vector.shape_cast %244 : vector<10x10xf32> to vector<1x10x10xf32>
    %cst_59 = arith.constant dense<0.000000e+00> : vector<1xf32>
    %246 = vector.multi_reduction <add>, %245, %cst_59 [1, 2] : vector<1x10x10xf32> to vector<1xf32>
    %247 = vector.shape_cast %246 : vector<1xf32> to vector<1x1x1xf32>
    %248 = vector.extract %247[0, 0, 0] : f32 from vector<1x1x1xf32>
    %c0_60 = arith.constant 0 : index
    %c0_61 = arith.constant 0 : index
    %249 = vector.load %arg10[%c0_60, %c0_61] : memref<1x1xf32, #tpu.memory_space<vmem>>, vector<1x1xf32>
    %250 = vector.broadcast %43 : f32 to vector<1x1xf32>
    %251 = arith.addf %249, %250 : vector<1x1xf32>
    %c0_62 = arith.constant 0 : index
    %c0_63 = arith.constant 0 : index
    %252 = vector.load %arg10[%c0_62, %c0_63] : memref<1x1xf32, #tpu.memory_space<vmem>>, vector<1x1xf32>
    tpu.vector_store %arg10[%c0_62, %c0_63], %251 {strides = array<i32>} : memref<1x1xf32, #tpu.memory_space<vmem>>, vector<1x1xf32>,
    %c0_64 = arith.constant 0 : index
    %c0_65 = arith.constant 0 : index
    %253 = vector.load %arg11[%c0_64, %c0_65] : memref<1x1xf32, #tpu.memory_space<vmem>>, vector<1x1xf32>
    %254 = vector.broadcast %240 : f32 to vector<1x1xf32>
    %255 = arith.addf %253, %254 : vector<1x1xf32>
    %c0_66 = arith.constant 0 : index
    %c0_67 = arith.constant 0 : index
    %256 = vector.load %arg11[%c0_66, %c0_67] : memref<1x1xf32, #tpu.memory_space<vmem>>, vector<1x1xf32>
    tpu.vector_store %arg11[%c0_66, %c0_67], %255 {strides = array<i32>} : memref<1x1xf32, #tpu.memory_space<vmem>>, vector<1x1xf32>,
    %c0_68 = arith.constant 0 : index
    %c0_69 = arith.constant 0 : index
    %257 = vector.load %arg12[%c0_68, %c0_69] : memref<1x1xf32, #tpu.memory_space<vmem>>, vector<1x1xf32>
    %258 = vector.broadcast %248 : f32 to vector<1x1xf32>
    %259 = arith.addf %257, %258 : vector<1x1xf32>
    %c0_70 = arith.constant 0 : index
    %c0_71 = arith.constant 0 : index
    %260 = vector.load %arg12[%c0_70, %c0_71] : memref<1x1xf32, #tpu.memory_space<vmem>>, vector<1x1xf32>
    tpu.vector_store %arg12[%c0_70, %c0_71], %259 {strides = array<i32>} : memref<1x1xf32, #tpu.memory_space<vmem>>, vector<1x1xf32>,
    %c1_i32 = arith.constant 1 : i32
    %261 = arith.cmpi eq, %arg0, %c1_i32 : i32
    %262 = arith.extui %261 : i1 to i32
    %c0_i32_72 = arith.constant 0 : i32
    %263 = arith.cmpi ne, %262, %c0_i32_72 : i32
    scf.if %263 {
      %c0_73 = arith.constant 0 : index
      %264 = memref.load %arg1[%c0_73] : memref<1xf32, #tpu.memory_space<smem>>
      %cst_74 = arith.constant 0.000000e+00 : f32
      %cst_75 = arith.constant 1.000000e+00 : f32
      %265 = arith.maximumf %cst_74, %264 : f32
      %266 = arith.minimumf %cst_75, %265 : f32
      %c0_76 = arith.constant 0 : index
      %c0_77 = arith.constant 0 : index
      %267 = vector.load %arg10[%c0_76, %c0_77] : memref<1x1xf32, #tpu.memory_space<vmem>>, vector<1x1xf32>
      %cst_78 = arith.constant 0.001953125 : f32
      %268 = vector.broadcast %cst_78 : f32 to vector<1x1xf32>
      %269 = arith.mulf %267, %268 : vector<1x1xf32>
      %c0_79 = arith.constant 0 : index
      %c0_80 = arith.constant 0 : index
      %270 = vector.load %arg11[%c0_79, %c0_80] : memref<1x1xf32, #tpu.memory_space<vmem>>, vector<1x1xf32>
      %cst_81 = arith.constant 5.000000e-03 : f32
      %271 = vector.broadcast %cst_81 : f32 to vector<1x1xf32>
      %272 = arith.mulf %270, %271 : vector<1x1xf32>
      %c0_82 = arith.constant 0 : index
      %c0_83 = arith.constant 0 : index
      %273 = vector.load %arg12[%c0_82, %c0_83] : memref<1x1xf32, #tpu.memory_space<vmem>>, vector<1x1xf32>
      %cst_84 = arith.constant 5.000000e-03 : f32
      %274 = vector.broadcast %cst_84 : f32 to vector<1x1xf32>
      %275 = arith.mulf %273, %274 : vector<1x1xf32>
      %cst_85 = arith.constant 1.000000e+00 : f32
      %276 = vector.broadcast %cst_85 : f32 to vector<1x1xf32>
      %277 = arith.subf %276, %272 : vector<1x1xf32>
      %cst_86 = arith.constant 5.000000e-01 : f32
      %278 = vector.broadcast %cst_86 : f32 to vector<1x1xf32>
      %279 = arith.mulf %277, %278 : vector<1x1xf32>
      %cst_87 = arith.constant 0.000000e+00 : f32
      %280 = vector.broadcast %cst_87 : f32 to vector<1x1xf32>
      %281 = arith.subf %280, %275 : vector<1x1xf32>
      %cst_88 = arith.constant 5.000000e-01 : f32
      %282 = vector.broadcast %cst_88 : f32 to vector<1x1xf32>
      %283 = arith.mulf %281, %282 : vector<1x1xf32>
      %284 = vector.broadcast %266 : f32 to vector<1x1xf32>
      %285 = arith.mulf %269, %284 : vector<1x1xf32>
      %cst_89 = arith.constant 1.000000e+00 : f32
      %286 = arith.subf %cst_89, %266 : f32
      %287 = vector.broadcast %286 : f32 to vector<1x1xf32>
      %288 = arith.mulf %287, %279 : vector<1x1xf32>
      %289 = arith.addf %285, %288 : vector<1x1xf32>
      %c0_90 = arith.constant 0 : index
      %c0_91 = arith.constant 0 : index
      %290 = vector.load %arg8[%c0_90, %c0_91] : memref<1x1xf32, #tpu.memory_space<vmem>>, vector<1x1xf32>
      tpu.vector_store %arg8[%c0_90, %c0_91], %289 {strides = array<i32>} : memref<1x1xf32, #tpu.memory_space<vmem>>, vector<1x1xf32>,
      %cst_92 = arith.constant 1.000000e+00 : f32
      %291 = arith.subf %cst_92, %266 : f32
      %292 = vector.broadcast %291 : f32 to vector<1x1xf32>
      %293 = arith.mulf %292, %283 : vector<1x1xf32>
      %c0_93 = arith.constant 0 : index
      %c0_94 = arith.constant 0 : index
      %294 = vector.load %arg9[%c0_93, %c0_94] : memref<1x1xf32, #tpu.memory_space<vmem>>, vector<1x1xf32>
      tpu.vector_store %arg9[%c0_93, %c0_94], %293 {strides = array<i32>} : memref<1x1xf32, #tpu.memory_space<vmem>>, vector<1x1xf32>,
    } else {
    }
    return
  }
  func.func @transform_0(%arg0: i32) -> i32 {
    %c0_i32 = arith.constant 0 : i32
    %c0_i32_0 = arith.constant 0 : i32
    return %c0_i32 : i32
  }
  func.func @transform_1(%arg0: i32) -> (i32, i32, i32) {
    %c0_i32 = arith.constant 0 : i32
    %c0_i32_0 = arith.constant 0 : i32
    %c0_i32_1 = arith.constant 0 : i32
    return %arg0, %c0_i32, %c0_i32_0 : i32, i32, i32
  }
  func.func @transform_2(%arg0: i32) -> (i32, i32, i32) {
    %c0_i32 = arith.constant 0 : i32
    %c0_i32_0 = arith.constant 0 : i32
    %c0_i32_1 = arith.constant 0 : i32
    return %arg0, %c0_i32, %c0_i32_0 : i32, i32, i32
  }
  func.func @transform_3(%arg0: i32) -> (i32, i32, i32) {
    %c0_i32 = arith.constant 0 : i32
    %c0_i32_0 = arith.constant 0 : i32
    %c0_i32_1 = arith.constant 0 : i32
    return %arg0, %c0_i32, %c0_i32_0 : i32, i32, i32
  }
  func.func @transform_4(%arg0: i32) -> (i32, i32, i32) {
    %c0_i32 = arith.constant 0 : i32
    %c0_i32_0 = arith.constant 0 : i32
    %c0_i32_1 = arith.constant 0 : i32
    return %arg0, %c0_i32, %c0_i32_0 : i32, i32, i32
  }
  func.func @transform_5(%arg0: i32) -> (i32, i32) {
    %c0_i32 = arith.constant 0 : i32
    %c0_i32_0 = arith.constant 0 : i32
    %c0_i32_1 = arith.constant 0 : i32
    return %c0_i32, %c0_i32_0 : i32, i32
  }
  func.func @transform_6(%arg0: i32) -> (i32, i32) {
    %c0_i32 = arith.constant 0 : i32
    %c0_i32_0 = arith.constant 0 : i32
    %c0_i32_1 = arith.constant 0 : i32
    return %c0_i32, %c0_i32_0 : i32, i32
  }
  func.func @transform_7(%arg0: i32) -> (i32, i32) {
    %c0_i32 = arith.constant 0 : i32
    %c0_i32_0 = arith.constant 0 : i32
    %c0_i32_1 = arith.constant 0 : i32
    return %c0_i32, %c0_i32_0 : i32, i32
  }
  func.func @transform_8(%arg0: i32) -> (i32, i32) {
    %c0_i32 = arith.constant 0 : i32
    %c0_i32_0 = arith.constant 0 : i32
    %c0_i32_1 = arith.constant 0 : i32
    return %c0_i32, %c0_i32_0 : i32, i32
  }
}

</mosaic_0001>

<bundles_post_ra>
// kernel: tpu_custom_call.1
= control target key start
LH: loop header
LB: loop body
LE: loop exit
PB: predicated region body
PF: predicated region fallthrough
CT: control target
= control target key end

     0   :  { %s2355_s0 = inlined_call_operand.<no memory space> [shape: f32[1], index: 0, kind: input, shape index: {}]   ;;  %s2356_s1 = inlined_call_operand.hbm [shape: f32[2,16,16], index: 1, kind: input, shape index: {}]   ;;  %s2357_s2 = inlined_call_operand.hbm [shape: f32[2,16,16], index: 2, kind: input, shape index: {}]   ;;  %s2358_s3 = inlined_call_operand.hbm [shape: f32[2,16,16], index: 3, kind: input, shape index: {}]   ;;  %s2359_s4 = inlined_call_operand.hbm [shape: f32[2,16,16], index: 4, kind: input, shape index: {}]   ;;  %s2360_s5 = inlined_call_operand.vmem [shape: bf16[10,32], index: 5, kind: input, shape index: {}]   ;;  %s2361_s6 = inlined_call_operand.vmem [shape: bf16[32,10], index: 6, kind: input, shape index: {}]   ;;  %s2362_s7 = inlined_call_operand.hbm [shape: f32[1,1], index: 7, kind: output, shape index: {0}]   ;;  %s2363_s8 = inlined_call_operand.hbm [shape: f32[1,1], index: 8, kind: output, shape index: {1}]  }
   0x1   :  { %2365 = sst [smem:[#allocation24_spill]] %s2356_s1 }
   0x2   :  { %2366 = sst [smem:[#allocation25_spill]] %s2357_s2 }
   0x3   :  { %14 = sst [smem:[#allocation5]] %s2355_s0 }
   0x4   :  { %15 = vsyncpa [#allocation7], 0 }
   0x5   :  { %17 = vsyncpa [#allocation7 + $0x1], 0 }
   0x6   :  { %18 = vsyncpa [#allocation10], 0 }
   0x7   :  { %20 = vsyncpa [#allocation10 + $0x1], 0 }
   0x8   :  { %21 = vsyncpa [#allocation13], 0 }
   0x9   :  { %23 = vsyncpa [#allocation13 + $0x1], 0 }
   0xa   :  { %24 = vsyncpa [#allocation8], 0 }
   0xb   :  { %25 = vsyncpa [#allocation16], 0  ;;  %s1822_s29 = smov 0   ;;  %s1824_s30 = smov 0  }
   0xc   :  { %s1826_s9 = smov 0   ;;  %s1828_s10 = smov 0  }
   0xd LB: > { %2367 = sst [smem:[#allocation22_spill]] %s1754_s9  ;;  %s1841_s0 = sadd.s32 4294967295, %s1758_s10   ;;  %s1758_s10 = sphi %s1828_s10, %s2378_s10   ;;  %s1754_s9 = sphi %s1826_s9, %s2375_s9   ;;  %s1750_s30 = sphi %s1824_s30, %s2377_s30   ;;  %s1746_s29 = sphi %s1822_s29, %s2376_s29  }
   0xe   : > { %s1844_s11 = sadd.s32 1, %s1758_s10   ;;  %s59_s13 = sadd.s32 1, %s1754_s9 }
   0xf   : > { %s56_s12 = ssub.s32 %s1758_s10, %s1844_s11  ;;  %p66_p1 = scmp.ne.s32.totalorder %s1754_s9, %s1750_s30 }
  0x10   : > { %p57_p0 = scmp.eq.s32.totalorder %s56_s12, 0  ;;  %p67_p2 = scmp.eq.s32.totalorder %s1758_s10, 0 }
  0x11   : > { %p72_p3 = scmp.ne.s32.totalorder %s1750_s30, %s1746_s29  ;;  %p73_p5 = scmp.eq.s32.totalorder %s1841_s0, 0 }
  0x12   : > { %s1854_s14 = scalar_select %p57_p0, %s1754_s9, %s59_s13  }
  0x13   : > { %p68_p4 = por %p67_p2, %p66_p1  ;;  %p1465_p6 = scmp.lt.s32.totalorder %s1758_s10, 2 }
  0x14   : > { %2368 = sst [smem:[#allocation23_spill]] %s1854_s14  ;;  %p1858_p7 = por %p73_p5, %p72_p3 }
  0x15   : > { %s1863_s16 = sand.u32 1, %s1754_s9   ;;  %s1869_s18 = sshll.u32 %s1758_s10, 4 }
  0x16   : > { %s1866_s17 = sshll.u32 %s1863_s16, 4  ;;  %p1871_p8 = pnand %p1465_p6, %p68_p4 }
  0x17   : > { %s289_s20 = sand.u32 1, %s1758_s10   ;;  %s2371_s2 = sld [smem:[#allocation25_spill]] }
  0x18   : > { %s293_s25 = scalar_lea.vmem [#allocation9], %s1866_s17  ;;  %s1881_s27 = scalar_lea.sflag [#allocation10], %s289_s20 }
  0x19   : > { %s301_s26 = sshll.u32 %s293_s25, 4  ;;  %p1536_p10 = pneg %p1871_p8  ;;  %s302_s26 = int_to_ptr.vmem [resolvable:$true] %s301_s26 }
  0x1d   : > { %s298_s23 = scalar_lea.hbm %s2371_s2, %s1869_s18  ;;  %s1539_s21 = scalar_lea.hbm %s2371_s2, 32 }
  0x1e   : > { %s299_s24 = sshll.u32 %s298_s23, 4  ;;  %s300_s24 = int_to_ptr.hbm [resolvable:$true] %s299_s24 }
  0x1f   : > { %s1532_s28 = sshra.s32 %s300_s24, 4  ;;  %s1533_s28 = int_to_ptr.hbm [resolvable:$true] %s1532_s28 }
  0x20   : > { %s1534_s29 = scalar_lea.hbm %s1533_s28, 16  ;;  %p1540_p13 = scmp.lt.s32.totalorder %s1533_s28, %s2371_s2 }
  0x21   : > { %p1535_p9 = scmp.ne.s32.totalorder %s1533_s28, %s1534_s29  ;;  %p1541_p0 = scmp.lt.s32.totalorder %s1539_s21, %s1534_s29 }
  0x23   : > { %p1537_p11 = pnand %p1536_p10, %p1535_p9  ;;  %p1542_p1 = por %p1541_p0, %p1540_p13 }
  0x25   : > { %p1538_p12 = pneg %p1537_p11 }
  0x27   : > { %p1543_p2 = pnand %p1542_p1, %p1538_p12 }
  0x29   : > { %1546 = shalt.err (!%p1543_p2)
}
  0x2a   : > { %s1760_s20 = smov 128   ;;  %s1761_s25 = smov 8  }
  0x2b   : > { %1458 = dma.hbm_to_vmem [thread:$0]  (!%p1871_p8), %s300_s24, 256, %s302_s26, %s1881_s27, %s1760_s20, %s1760_s20, %s1761_s25  }
  0x2c   : > { %p1386_p3 = scmp.ge.s32.totalorder %s1758_s10, 1  ;;  %p353_p4 = scmp.lt.s32.totalorder %s1758_s10, 3 }
  0x2d   : > { %s2373_s1 = sld [smem:[#allocation24_spill]]  ;;  %s271_s22 = scalar_lea.vmem [#allocation6], %s1866_s17 }
  0x2e   : > { %p1902_p5 = pnand %p1386_p3, %p353_p4  ;;  %s279_s23 = sshll.u32 %s271_s22, 4  ;;  %s280_s23 = int_to_ptr.vmem [resolvable:$true] %s279_s23 }
  0x2f   : > { %s268_s2 = scalar_lea.sflag [#allocation7], %s1863_s16 }
  0x33   : > { %s276_s13 = scalar_lea.hbm %s2373_s1, %s1869_s18  ;;  %s1569_s26 = scalar_lea.hbm %s2373_s1, 32 }
  0x34   : > { %s277_s21 = sshll.u32 %s276_s13, 4  ;;  %s278_s21 = int_to_ptr.hbm [resolvable:$true] %s277_s21 }
  0x35   : > { %s1562_s14 = sshra.s32 %s278_s21, 4  ;;  %s1563_s14 = int_to_ptr.hbm [resolvable:$true] %s1562_s14 }
  0x36   : > { %s1564_s9 = scalar_lea.hbm %s1563_s14, 16  ;;  %p1570_p12 = scmp.lt.s32.totalorder %s1563_s14, %s2373_s1 }
  0x37   : > { %p1565_p6 = scmp.ne.s32.totalorder %s1563_s14, %s1564_s9  ;;  %p1571_p13 = scmp.lt.s32.totalorder %s1569_s26, %s1564_s9 }
  0x39   : > { %p1567_p9 = pnand %p1565_p6, %p1536_p10  ;;  %p1572_p0 = por %p1571_p13, %p1570_p12 }
  0x3b   : > { %p1568_p11 = pneg %p1567_p9 }
  0x3d   : > { %p1573_p1 = pnand %p1572_p0, %p1568_p11 }
  0x3f   : > { %1576 = shalt.err (!%p1573_p1)
}
  0x40   : > { %1455 = dma.hbm_to_vmem [thread:$0]  (!%p1871_p8), %s278_s21, 256, %s280_s23, %s268_s2, %s1760_s20, %s1760_s20, %s1761_s25  }
  0x41   : > { %s320_s10 = scalar_lea.hbm %s2358_s3, %s1869_s18  ;;  %s315_s29 = scalar_lea.vmem [#allocation11], %s1866_s17 }
  0x42   : > { %s321_s24 = sshll.u32 %s320_s10, 4  ;;  %s323_s14 = sshll.u32 %s315_s29, 4  ;;  %s322_s24 = int_to_ptr.hbm [resolvable:$true] %s321_s24  ;;  %s324_s14 = int_to_ptr.vmem [resolvable:$true] %s323_s14 }
  0x43   : > { %s1592_s9 = sshra.s32 %s322_s24, 4  ;;  %s1599_s2 = scalar_lea.hbm %s2358_s3, 32  ;;  %s1593_s9 = int_to_ptr.hbm [resolvable:$true] %s1592_s9 }
  0x44   : > { %s1594_s26 = scalar_lea.hbm %s1593_s9, 16  ;;  %p1600_p6 = scmp.lt.s32.totalorder %s1593_s9, %s2358_s3 }
  0x45   : > { %p1595_p2 = scmp.ne.s32.totalorder %s1593_s9, %s1594_s26  ;;  %p1601_p9 = scmp.lt.s32.totalorder %s1599_s2, %s1594_s26 }
  0x47   : > { %p1597_p3 = pnand %p1595_p2, %p1536_p10  ;;  %p1602_p11 = por %p1601_p9, %p1600_p6 }
  0x49   : > { %p1598_p4 = pneg %p1597_p3 }
  0x4b   : > { %p1603_p12 = pnand %p1602_p11, %p1598_p4 }
  0x4d   : > { %1606 = shalt.err (!%p1603_p12)
}
  0x4e   : > { %1461 = dma.hbm_to_vmem [thread:$0]  (!%p1871_p8), %s322_s24, 256, %s324_s14, %s1881_s27, %s1760_s20, %s1760_s20, %s1761_s25  }
  0x4f   : > { %s342_s22 = scalar_lea.hbm %s2359_s4, %s1869_s18  ;;  %s337_s10 = scalar_lea.vmem [#allocation12], %s1866_s17 }
  0x50   : > { %s345_s29 = sshll.u32 %s337_s10, 4  ;;  %s343_s9 = sshll.u32 %s342_s22, 4  ;;  %s346_s29 = int_to_ptr.vmem [resolvable:$true] %s345_s29  ;;  %s344_s9 = int_to_ptr.hbm [resolvable:$true] %s343_s9 }
  0x51   : > { %s334_s26 = scalar_lea.sflag [#allocation13], %s1863_s16  ;;  %s1622_s12 = sshra.s32 %s344_s9, 4  ;;  %s1623_s12 = int_to_ptr.hbm [resolvable:$true] %s1622_s12 }
  0x52   : > { %s1624_s2 = scalar_lea.hbm %s1623_s12, 16  ;;  %s1629_s24 = scalar_lea.hbm %s2359_s4, 32 }
  0x53   : > { %p1625_p13 = scmp.ne.s32.totalorder %s1623_s12, %s1624_s2  ;;  %p1630_p2 = scmp.lt.s32.totalorder %s1623_s12, %s2359_s4 }
  0x54   : > { %p1631_p3 = scmp.lt.s32.totalorder %s1629_s24, %s1624_s2 }
  0x55   : > { %p1627_p0 = pnand %p1625_p13, %p1536_p10 }
  0x56   : > { %p1632_p4 = por %p1631_p3, %p1630_p2 }
  0x57   : > { %p1628_p1 = pneg %p1627_p0 }
  0x59   : > { %p1633_p6 = pnand %p1632_p4, %p1628_p1 }
  0x5b   : > { %1636 = shalt.err (!%p1633_p6)
}
  0x5c   : > { %1464 = dma.hbm_to_vmem [thread:$0]  (!%p1871_p8), %s344_s9, 256, %s346_s29, %s334_s26, %s1760_s20, %s1760_s20, %s1761_s25  }
  0x5d   : > { %357 = sbr.rel (%p1902_p5) target bundleno = 965 (0x3c5), region = 48  ;;  %s359_s16 = sand.u32 (!%p1902_p5), 1, %s1750_s30  }
  0x5e   : > { %s1969_s17 = sshll.u32 (!%p1902_p5), %s359_s16, 4  ;;  %s360_s23 = scalar_lea.sflag (!%p1902_p5), [#allocation7], %s359_s16 }
  0x5f   : > { %s363_s1 = scalar_lea.vmem (!%p1902_p5), [#allocation6], %s1969_s17 }
  0x62   : > { %1725 = dma.done.wait (%p1858_p7), %s360_s23, 256  }
  0x63   : > { %1727 = vsyncadd (%p1858_p7), %s360_s23, 4294967040  ;;  %s369_s19 = sand.u32 1, %s1841_s0   ;;  %s373_s25 = scalar_lea.vmem [#allocation9], %s1969_s17 }
  0x64   : > { %s370_s20 = scalar_lea.sflag [#allocation10], %s369_s19 }
  0x65   : > { %1729 = dma.done.wait (%p1858_p7), %s370_s20, 512  }
  0x66   : > { %1731 = vsyncadd (%p1858_p7), %s370_s20, 4294966784  ;;  %s383_s28 = scalar_lea.vmem [#allocation11], %s1969_s17  ;;  %s390_s13 = scalar_lea.sflag [#allocation13], %s359_s16 }
  0x67   : > { %s393_s22 = scalar_lea.vmem [#allocation12], %s1969_s17 }
  0x68   : > { %1733 = dma.done.wait (%p1858_p7), %s390_s13, 256  }
  0x69   : > { %1735 = vsyncadd (%p1858_p7), %s390_s13, 4294967040  ;;  %p1391_p8 = scmp.ne.s32.totalorder %s1841_s0, 0 }
  0x6b   : > { %441 = sbr.rel (%p1391_p8) target bundleno = 116 (0x74), region = 68 }
  0x70   : > { %vm442_vm0 = vcmask 0   ;;  %v1762_v0 = vmov 0.0  }
  0x71   : > { %443 = vst.msk [vmem:[#allocation2] sm:$0x1] %vm442_vm0, %v1762_v0 }
  0x72   : > { %444 = vst.msk [vmem:[#allocation3] sm:$0x1] %vm442_vm0, %v1762_v0 }
  0x73   : > { %445 = vst.msk [vmem:[#allocation4] sm:$0x1] %vm442_vm0, %v1762_v0 }
  0x74 PF: > { %v1991_v1 = vld [vmem:[%s383_s28] sm:$0xff]  ;;  %s1763_s15 = smov 32   ;;  %s1764_s10 = smov 16   ;;  %v1999_v3 = vld [vmem:[%s373_s25 + $0x8] sm:$0xff]  ;;  %vm548_vm1 = vcmask 130048   ;;  %vm649_vm2 = vcmask 261120  }
  0x75   : > { %v1993_v2 = vld [vmem:[%s373_s25] sm:$0xff]  ;;  %593 = vrot.lane.b32.xlu1 %v1991_v1, %s1763_s15  ;;  %v2003_v4 = vld [vmem:[%s363_s1 + $0x8] sm:$0xff]  ;;  %v457_v6 = vmul.f32 %v1999_v3, %v1999_v3  ;;  %s1765_s29 = smov 48   ;;  %v484_v11 = vmul.f32 %v1991_v1, %v1991_v1  ;;  %s1766_s9 = smov 64   ;;  %v569_v36 = vmul.f32 2.0, %v1991_v1  ;;  %vm652_vm3 = vcmask 392192  }
  0x76   : > { %585 = vrot.lane.b32.xlu0 %v1993_v2, %s1764_s10  ;;  %v455_v5 = vmul.f32 %v2003_v4, %v2003_v4  ;;  %v2011_v7 = vld [vmem:[%s363_s1] sm:$0xff]  ;;  %v456_v10 = vmul.f32 %v1993_v2, %v1993_v2  ;;  %v2031_v14 = vld [vmem:[%s383_s28 + $0x8] sm:$0xff]  ;;  %v2065_v24 = vmul.f32 %v1991_v1, %v1993_v2  ;;  %v564_v31 = vmul.f32 2.0, %v2003_v4  ;;  %s1767_s26 = smov 80   ;;  %s1768_s12 = smov 96  }
  0x77   : > { %v2015_v8 = vld [vmem:[%s393_s22] sm:$0xff]  ;;  %v454_v9 = vmul.f32 %v2011_v7, %v2011_v7  ;;  %v2039_v17 = vld [vmem:[%s393_s22 + $0x8] sm:$0xff]  ;;  %v2047_v19 = vmul.f32 %v2031_v14, %v1999_v3  ;;  %v485_v21 = vmul.f32 %v2031_v14, %v2031_v14  ;;  %v563_v25 = vmul.f32 2.0, %v2011_v7  ;;  %s1769_s2 = smov 112   ;;  %p1416_p7 = scmp.ne.s32.totalorder %s1841_s0, 1 }
  0x78   : > { %601 = vrot.lane.b32.xlu2 %v2015_v8, %s1765_s29  ;;  %v486_v12 = vmul.f32 %v2015_v8, %v2015_v8  ;;  %v2027_v13 = vadd.f32 %v457_v6, %v455_v5  ;;  %v2043_v18 = vmul.f32 %v2039_v17, %v2003_v4  ;;  %v487_v22 = vmul.f32 %v2039_v17, %v2039_v17  ;;  %s1200_s25 = sld [smem:[#allocation5]] (!%p1416_p7)  ;;  %s1770_s28 = smov (!%p1416_p7), 0.0  }
  0x79   : > { %v2033_v15 = vadd.f32 %v456_v10, %v454_v9  ;;  %v2061_v23 = vmul.f32 %v2015_v8, %v2011_v7  ;;  %v562_v28 = vsub.f32 %v455_v5, %v457_v6  ;;  %v561_v29 = vsub.f32 %v454_v9, %v456_v10  ;;  %s1771_s22 = smov (!%p1416_p7), 1.0  }
  0x7a   : > { %v2035_v16 = vadd.f32 %v486_v12, %v484_v11  ;;  %v519_v20 = vsub.f32 %v2043_v18, %v2047_v19  ;;  %v2070_v26 = vadd.f32 %v487_v22, %v485_v21  ;;  %v565_v30 = vmul.f32 %v563_v25, %v1993_v2 }
  0x7b   : > { %v518_v27 = vsub.f32 %v2061_v23, %v2065_v24  ;;  %v567_v32 = vsub.f32 %v484_v11, %v486_v12  ;;  %v566_v33 = vmul.f32 %v564_v31, %v1999_v3  ;;  %v568_v34 = vsub.f32 %v485_v21, %v487_v22 }
  0x7c   : > { %v570_v35 = vmul.f32 2.0, %v2031_v14  ;;  %v571_v38 = vmul.f32 %v569_v36, %v2015_v8  ;;  %v575_v39 = vadd.f32 %v2065_v24, %v2061_v23  ;;  %v576_v40 = vadd.f32 %v2047_v19, %v2043_v18 }
  0x7d   : > { %595 = vrot.lane.b32.xlu1 %v2031_v14, %s1763_s15  ;;  %v2099_v52 = vmul.f32 %v1991_v1, %v2011_v7  ;;  %v2103_v53 = vmul.f32 %v2015_v8, %v1993_v2  ;;  %vm655_vm4 = vcmask 523264   ;;  %vm658_vm5 = vcmask 654336  }
  0x7e   : > { %587 = vrot.lane.b32.xlu0 %v1999_v3, %s1764_s10  ;;  %v572_v37 = vmul.f32 %v570_v35, %v2039_v17  ;;  %vm661_vm6 = vcmask 785408   ;;  %vm664_vm7 = vcmask 916480   ;;  %v2119_v6 = vmul.f32 %v2031_v14, %v2003_v4  ;;  %s1201_s13 = smax.f32 (!%p1416_p7), %s1770_s28, %s1200_s25 }
  0x7f   : > { %v573_v57 = vsub.f32 %v2099_v52, %v2103_v53  ;;  %1516 = vrsqrt.f32 %v2027_v13  ;;  %vm467_vm8 = vcmp.eq.f32.partialorder %v2033_v15, inf  ;;  %vm469_vm9 = vcmp.eq.f32.partialorder %v2033_v15, 0.0 }
  0x80   : > { %603 = vrot.lane.b32.xlu2 %v2039_v17, %s1765_s29  ;;  %1518 = vrsqrt.f32 %v2033_v15  ;;  %vm479_vm10 = vcmp.eq.f32.partialorder %v2027_v13, inf  ;;  %vm481_vm11 = vcmp.eq.f32.partialorder %v2027_v13, 0.0  ;;  %vm497_vm12 = vcmp.eq.f32.partialorder %v2035_v16, inf }
  0x81   : > { %1520 = vrsqrt.f32 %v2035_v16  ;;  %vm499_vm13 = vcmp.eq.f32.partialorder %v2035_v16, 0.0  ;;  %vm509_vm14 = vcmp.eq.f32.partialorder %v2070_v26, inf  ;;  %vm511_vm15 = vcmp.eq.f32.partialorder %v2070_v26, 0.0 }
  0x82   : > { %1522 = vrsqrt.f32 %v2070_v26 }
  0x85   : > { %611 = vrot.lane.b32.xlu1 %v562_v28, %s1766_s9 }
  0x86   : > { %609 = vrot.lane.b32.xlu0 %v561_v29, %s1766_s9 }
  0x88   : > { %617 = vrot.lane.b32.xlu2 %v565_v30, %s1767_s26 }
  0x8d   : > { %625 = vrot.lane.b32.xlu1 %v567_v32, %s1768_s12 }
  0x8e   : > { %619 = vrot.lane.b32.xlu0 %v566_v33, %s1767_s26 }
  0x90   : > { %627 = vrot.lane.b32.xlu2 %v568_v34, %s1768_s12 }
  0x95   : > { %635 = vrot.lane.b32.xlu1 %v572_v37, %s1769_s2 }
  0x96   : > { %633 = vrot.lane.b32.xlu0 %v571_v38, %s1769_s2 }
  0x98   : > { %641 = vrot.lane.b32.xlu2 %v575_v39, %s1764_s10 }
  0x9e   : > { %643 = vrot.lane.b32.xlu0 %v576_v40, %s1764_s10 }
  0xd2   : > { %v602_v41 = vpop.permute.xlu2 %601 }
  0xda   : > { %v604_v42 = vpop.permute.xlu2 %603 }
  0xe2   : > { %v618_v45 = vpop.permute.xlu2 %617 }
  0xe7   : > { %v594_v43 = vpop.permute.xlu1 %593 }
  0xe8   : > { %v586_v44 = vpop.permute.xlu0 %585 }
  0xe9   : > { %v647_v51 = vsel %vm548_vm1, %v2011_v7, %v586_v44  ;;  %v2123_v7 = vmul.f32 %v2039_v17, %v1999_v3 }
  0xea   : > { %v628_v50 = vpop.permute.xlu2 %627  ;;  %v650_v54 = vsel %vm649_vm2, %v647_v51, %v594_v43 }
  0xeb   : > { %v653_v56 = vsel %vm652_vm3, %v650_v54, %v602_v41  ;;  %v574_v12 = vsub.f32 %v2119_v6, %v2123_v7 }
  0xef   : > { %v596_v46 = vpop.permute.xlu1 %595 }
  0xf0   : > { %v588_v47 = vpop.permute.xlu0 %587 }
  0xf1   : > { %v648_v61 = vsel %vm548_vm1, %v2003_v4, %v588_v47  ;;  %v1394_v47 = vld [vmem:[%s2360_s5] sm:$0xf] }
  0xf2   : > { %v642_v60 = vpop.permute.xlu2 %641  ;;  %v651_v0 = vsel %vm649_vm2, %v648_v61, %v596_v46 }
  0xf3   : > { %v667_v63 = vsel %vm548_vm1, %v573_v57, %v642_v60  ;;  %v654_v9 = vsel %vm652_vm3, %v651_v0, %v604_v42  ;;  %vm1151_vm3 = vcmask 74752  }
  0xf7   : > { %v612_v49 = vpop.permute.xlu1 %611 }
  0xf8   : > { %v610_v48 = vpop.permute.xlu0 %609  ;;  %v657_v10 = vsel %vm655_vm4, %v654_v9, %v612_v49 }
  0xf9   : > { %v656_v58 = vsel %vm655_vm4, %v653_v56, %v610_v48  ;;  %v1427_v48 = vld [vmem:[%s2360_s5] sm:$0x10]  ;;  %vm1186_vm4 = vcmask 0  }
  0xfa   : > { %v659_v62 = vsel %vm658_vm5, %v656_v58, %v618_v45  ;;  %v1395_v51 = vor.u32 %v1427_v48, %v1394_v47 }
  0xff   : > { %v626_v59 = vpop.permute.xlu1 %625 }
 0x100   : > { %v620_v55 = vpop.permute.xlu0 %619  ;;  %v662_v1 = vsel %vm661_vm6, %v659_v62, %v626_v59 }
 0x101   : > { %v660_v11 = vsel %vm658_vm5, %v657_v10, %v620_v55 }
 0x102   : > { %v663_v4 = vsel %vm661_vm6, %v660_v11, %v628_v50 }
 0x107   : > { %v636_v21 = vpop.permute.xlu1 %635 }
 0x108   : > { %v634_v2 = vpop.permute.xlu0 %633  ;;  %v666_v28 = vsel %vm664_vm7, %v663_v4, %v636_v21  ;;  %v1429_v4 = vld [vmem:[%s2361_s6 + $0x8] sm:$0xff] }
 0x109   : > { %v665_v5 = vsel %vm664_vm7, %v662_v1, %v634_v2  ;;  %803 = vmatpush.bf16.msra.mxu3 %v1429_v4  ;;  %780 = vmatpush.bf16.msra.mxu2 %v1429_v4 }
 0x10a   : > { %v669_v8 = vpack.c.bf16 %v667_v63, %v665_v5 }
 0x10c   : > { %v671_v22 = vunpack.c.l.bf16 %v669_v8  ;;  %v672_v25 = vunpack.c.h.bf16 %v669_v8  ;;  %v683_v45 = vunpack.c.l.b16 %v669_v8  ;;  %v684_v46 = vunpack.c.h.b16 %v669_v8 }
 0x10e   : > { %v675_v17 = vsub.f32 %v665_v5, %v671_v22  ;;  %v676_v30 = vsub.f32 %v667_v63, %v672_v25 }
 0x110   : > { %v644_v14 = vpop.permute.xlu0 %643  ;;  %v679_v35 = vpack.c.bf16 %v676_v30, %v675_v17 }
 0x111   : > { %v668_v3 = vsel %vm548_vm1, %v574_v12, %v644_v14 }
 0x112   : > { %v670_v29 = vpack.c.bf16 %v668_v3, %v666_v28  ;;  %v693_v37 = vunpack.c.l.b16 %v679_v35  ;;  %v694_v39 = vunpack.c.h.b16 %v679_v35 }
 0x114   : > { %v674_v31 = vunpack.c.h.bf16 %v670_v29  ;;  %v673_v32 = vunpack.c.l.bf16 %v670_v29  ;;  %v685_v43 = vunpack.c.l.b16 %v670_v29  ;;  %v686_v44 = vunpack.c.h.b16 %v670_v29 }
 0x116   : > { %v678_v33 = vsub.f32 %v668_v3, %v674_v31  ;;  %v677_v34 = vsub.f32 %v666_v28, %v673_v32  ;;  %v687_v49 = vpack.c.b16 %v685_v43, %v683_v45  ;;  %v688_v50 = vpack.c.b16 %v686_v44, %v684_v46  ;;  %v1428_v3 = vld [vmem:[%s2361_s6] sm:$0xff] }
 0x117   : > { %804 = vmatpush.bf16.msra.mxu3 %v1428_v3  ;;  %781 = vmatpush.bf16.msra.mxu2 %v1428_v3 }
 0x118   : > { %v680_v36 = vpack.c.bf16 %v678_v33, %v677_v34 }
 0x11a   : > { %v695_v38 = vunpack.c.l.b16 %v680_v36  ;;  %v696_v40 = vunpack.c.h.b16 %v680_v36 }
 0x11b   : > { %878 = vmatpush.bf16.msrb.mxu2 %v1429_v4  ;;  %903 = vmatpush.bf16.msrb.mxu3 %v1429_v4 }
 0x11c   : > { %v697_v41 = vpack.c.b16 %v695_v38, %v693_v37  ;;  %v698_v42 = vpack.c.b16 %v696_v40, %v694_v39 }
 0x11e   : > { %715 = vmatpush.bf16.msra.mxu0 %v697_v41  ;;  %729 = vmatpush.bf16.msra.mxu1 %v698_v42 }
 0x11f   : > { %879 = vmatpush.bf16.msrb.mxu2 %v1428_v3  ;;  %904 = vmatpush.bf16.msrb.mxu3 %v1428_v3 }
 0x122   : > { %716 = vmatpush.bf16.msra.mxu0 %v687_v49  ;;  %730 = vmatpush.bf16.msra.mxu1 %v688_v50 }
 0x125   : > { %1396 = vmatmul.msk.bf16.vlgmr.msra.gmra.mxu0 %vm649_vm2, %v1395_v51  ;;  %1397 = vmatmul.msk.bf16.vlgmr.msra.gmra.mxu1 %vm649_vm2, %v1395_v51 }
 0x126   : > { %853 = vmatpush.bf16.msrb.mxu1 %v1429_v4  ;;  %828 = vmatpush.bf16.msrb.mxu0 %v1429_v4 }
 0x12a   : > { %854 = vmatpush.bf16.msrb.mxu1 %v1428_v3  ;;  %829 = vmatpush.bf16.msrb.mxu0 %v1428_v3 }
 0x12e   : > { %928 = vmatpush.bf16.msra.mxu0 %v1429_v4  ;;  %953 = vmatpush.bf16.msra.mxu1 %v1429_v4 }
 0x132   : > { %929 = vmatpush.bf16.msra.mxu0 %v1428_v3  ;;  %954 = vmatpush.bf16.msra.mxu1 %v1428_v3 }
 0x1a2   : > { %v718_v54 = vpop.f32.mrf.mxu0  ;;  %v732_v60 = vpop.f32.mrf.mxu1 }
 0x1a3   : > { %v737_v55 = vpack.c.bf16 %v718_v54, %v718_v54  ;;  %v963_v12 = vpack.c.bf16 %v732_v60, %v732_v60 }
 0x1a5   : > { %v739_v56 = vunpack.c.l.bf16 %v737_v55  ;;  %v747_v61 = vunpack.c.l.b16 %v737_v55  ;;  %v965_v22 = vunpack.c.l.bf16 %v963_v12  ;;  %v973_v33 = vunpack.c.l.b16 %v963_v12 }
 0x1a7   : > { %v741_v58 = vsub.f32 %v718_v54, %v739_v56  ;;  %v967_v14 = vsub.f32 %v732_v60, %v965_v22 }
 0x1a9   : > { %v743_v0 = vpack.c.bf16 %v741_v58, %v741_v58  ;;  %v969_v17 = vpack.c.bf16 %v967_v14, %v967_v14 }
 0x1aa   : > { %v720_v57 = vpop.f32.mrf.mxu0  ;;  %v734_v11 = vpop.f32.mrf.mxu1 }
 0x1ab   : > { %v738_v59 = vpack.c.bf16 %v720_v57, %v720_v57  ;;  %v752_v8 = vunpack.c.l.b16 %v743_v0  ;;  %v964_v21 = vpack.c.bf16 %v734_v11, %v734_v11  ;;  %v978_v30 = vunpack.c.l.b16 %v969_v17  ;;  %v1517_v0 = vpop.eup %1516 }
 0x1ad   : > { %v740_v62 = vunpack.c.l.bf16 %v738_v59  ;;  %v748_v63 = vunpack.c.l.b16 %v738_v59  ;;  %v966_v25 = vunpack.c.l.bf16 %v964_v21  ;;  %v974_v34 = vunpack.c.l.b16 %v964_v21 }
 0x1af   : > { %v742_v1 = vsub.f32 %v720_v57, %v740_v62  ;;  %v749_v2 = vpack.c.b16 %v748_v63, %v747_v61  ;;  %v968_v28 = vsub.f32 %v734_v11, %v966_v25  ;;  %v975_v35 = vpack.c.b16 %v974_v34, %v973_v33 }
 0x1b1   : > { %v744_v5 = vpack.c.bf16 %v742_v1, %v742_v1  ;;  %813 = vrot.lane.b32.xlu0 %v749_v2, %s1768_s12  ;;  %790 = vrot.lane.b32.xlu2 %v749_v2, %s1769_s2  ;;  %v970_v29 = vpack.c.bf16 %v968_v28, %v968_v28  ;;  %v1519_v1 = vpop.eup %1518 }
 0x1b3   : > { %v753_v9 = vunpack.c.l.b16 %v744_v5  ;;  %v979_v31 = vunpack.c.l.b16 %v970_v29  ;;  %v461_v5 = vmul.f32 %v1519_v1, %v2033_v15 }
 0x1b5   : > { %v754_v10 = vpack.c.b16 %v753_v9, %v752_v8  ;;  %v980_v32 = vpack.c.b16 %v979_v31, %v978_v30  ;;  %v473_v8 = vmul.f32 %v1517_v0, %v2027_v13 }
 0x1b7   : > { %755 = vrot.lane.b32.xlu1 %v754_v10, %s1764_s10  ;;  %v474_v11 = vmul.f32 %v1517_v0, %v473_v8 }
 0x1b9   : > { %838 = vrot.lane.b32.xlu2 %v749_v2, %s1767_s26  ;;  %840 = vrot.lane.b32.xlu0 %v754_v10, %s1768_s12  ;;  %v475_v21 = vmul.f32 0.5, %v474_v11 }
 0x1bb   : > { %v476_v14 = vsub.f32 1.5, %v475_v21 }
 0x1bd   : > { %v477_v34 = vmul.f32 %v1517_v0, %v476_v14  ;;  %v482_v0 = vand.u32 2147483648, %v2027_v13 }
 0x1bf   : > { %815 = vrot.lane.b32.xlu1 %v754_v10, %s1769_s2 }
 0x1c1   : > { %865 = vrot.lane.b32.xlu2 %v754_v10, %s1767_s26  ;;  %888 = vrot.lane.b32.xlu0 %v749_v2, %s1765_s29 }
 0x1c7   : > { %863 = vrot.lane.b32.xlu1 %v749_v2, %s1766_s9 }
 0x1c9   : > { %913 = vrot.lane.b32.xlu2 %v749_v2, %s1763_s15  ;;  %915 = vrot.lane.b32.xlu0 %v754_v10, %s1765_s29 }
 0x1cf   : > { %890 = vrot.lane.b32.xlu1 %v754_v10, %s1766_s9 }
 0x1d1   : > { %940 = vrot.lane.b32.xlu2 %v754_v10, %s1763_s15  ;;  %981 = vrot.lane.b32.xlu0 %v980_v32, %s1764_s10  ;;  %s1202_s15 = smin.f32 (!%p1416_p7), %s1771_s22, %s1201_s13 }
 0x1d7   : > { %938 = vrot.lane.b32.xlu1 %v749_v2, %s1764_s10  ;;  %s1215_s10 = ssub.f32 (!%p1416_p7), 1.0, %s1202_s15 }
 0x1df   : > { %1004 = vrot.lane.b32.xlu1 %v975_v35, %s1769_s2 }
 0x20b   : > { %v791_v36 = vpop.permute.xlu2 %790 }
 0x20c   : > { %v794_v37 = vsel %vm548_vm1, %v791_v36, %v754_v10  ;;  %v462_v10 = vmul.f32 %v1519_v1, %v461_v5 }
 0x20d   : > { %1407 = vmatmul.msk.bf16.vlgmr.msra.gmra.mxu3 %vm649_vm2, %v794_v37 }
 0x20e   : > { %1017 = vmatpush.bf16.msra.mxu3 %v1429_v4  ;;  %v463_v12 = vmul.f32 0.5, %v462_v10 }
 0x210   : > { %v464_v25 = vsub.f32 1.5, %v463_v12 }
 0x212   : > { %1018 = vmatpush.bf16.msra.mxu3 %v1428_v3  ;;  %v465_v30 = vmul.f32 %v1519_v1, %v464_v25 }
 0x213   : > { %v839_v41 = vpop.permute.xlu2 %838 }
 0x214   : > { %v466_v33 = vmul.f32 %v465_v30, %v2033_v15 }
 0x216   : > { %v468_v24 = vsel %vm467_vm8, %v2033_v15, %v466_v33 }
 0x21b   : > { %v866_v47 = vpop.permute.xlu2 %865 }
 0x223   : > { %v814_v38 = vpop.permute.xlu0 %813  ;;  %v914_v51 = vpop.permute.xlu2 %913 }
 0x229   : > { %v756_v39 = vpop.permute.xlu1 %755 }
 0x22a   : > { %v759_v40 = vsel %vm548_vm1, %v749_v2, %v756_v39 }
 0x22b   : > { %v841_v42 = vpop.permute.xlu0 %840  ;;  %1406 = vmatmul.msk.bf16.vlgmr.msra.gmra.mxu2 %vm649_vm2, %v759_v40  ;;  %v941_v58 = vpop.permute.xlu2 %940 }
 0x22c   : > { %v844_v43 = vsel %vm548_vm1, %v839_v41, %v841_v42  ;;  %994 = vmatpush.bf16.msra.mxu2 %v1429_v4 }
 0x22d   : > { %1409 = vmatmul.msk.bf16.vlgmr.msrb.gmra.mxu1 %vm649_vm2, %v844_v43  ;;  %v470_v43 = vand.u32 2147483648, %v2033_v15 }
 0x230   : > { %995 = vmatpush.bf16.msra.mxu2 %v1428_v3 }
 0x231   : > { %v816_v44 = vpop.permute.xlu1 %815 }
 0x232   : > { %v819_v45 = vsel %vm548_vm1, %v814_v38, %v816_v44 }
 0x233   : > { %v889_v46 = vpop.permute.xlu0 %888  ;;  %1408 = vmatmul.msk.bf16.vlgmr.msrb.gmra.mxu0 %vm649_vm2, %v819_v45 }
 0x239   : > { %v864_v48 = vpop.permute.xlu1 %863 }
 0x23a   : > { %v869_v49 = vsel %vm548_vm1, %v864_v48, %v866_v47 }
 0x23b   : > { %1410 = vmatmul.msk.bf16.vlgmr.msrb.gmra.mxu2 %vm649_vm2, %v869_v49  ;;  %v916_v50 = vpop.permute.xlu0 %915  ;;  %v1521_v49 = vpop.eup %1520 }
 0x23c   : > { %v919_v55 = vsel %vm548_vm1, %v914_v51, %v916_v50  ;;  %v491_v1 = vmul.f32 %v1521_v49, %v2035_v16 }
 0x23e   : > { %v492_v14 = vmul.f32 %v1521_v49, %v491_v1 }
 0x240   : > { %v493_v33 = vmul.f32 0.5, %v492_v14 }
 0x241   : > { %v891_v54 = vpop.permute.xlu1 %890 }
 0x242   : > { %v894_v56 = vsel %vm548_vm1, %v889_v46, %v891_v54 }
 0x243   : > { %1411 = vmatmul.msk.bf16.vlgmr.msrb.gmra.mxu3 %vm649_vm2, %v894_v56  ;;  %1412 = vmatmul.msk.bf16.vlgmr.msra.gmra.mxu0 %vm649_vm2, %v919_v55  ;;  %v982_v57 = vpop.permute.xlu0 %981  ;;  %v1523_v55 = vpop.eup %1522 }
 0x244   : > { %v985_v60 = vsel %vm548_vm1, %v975_v35, %v982_v57  ;;  %v2198_v35 = vand.u32 2147483647, %v518_v27  ;;  %v478_v27 = vmul.f32 %v477_v34, %v2027_v13 }
 0x249   : > { %v939_v59 = vpop.permute.xlu1 %938 }
 0x24a   : > { %v944_v61 = vsel %vm548_vm1, %v939_v59, %v941_v58  ;;  %v471_v58 = vsel %vm469_vm9, %v470_v43, %v468_v24 }
 0x24b   : > { %1413 = vmatmul.msk.bf16.vlgmr.msra.gmra.mxu1 %vm649_vm2, %v944_v61  ;;  %1414 = vmatmul.msk.bf16.vlgmr.msra.gmra.mxu2 %vm649_vm2, %v985_v60  ;;  %v480_v61 = vsel %vm479_vm10, %v2027_v13, %v478_v27  ;;  %v522_v10 = vadd.f32 1e-08, %v471_v58  ;;  %v500_v58 = vand.u32 2147483648, %v2035_v16 }
 0x24d   : > { %1524 = vrcp.f32 %v522_v10 }
 0x251   : > { %v1005_v62 = vpop.permute.xlu1 %1004 }
 0x252   : > { %v1008_v63 = vsel %vm548_vm1, %v1005_v62, %v980_v32  ;;  %v2191_v32 = vand.u32 2147483647, %v519_v20 }
 0x253   : > { %1415 = vmatmul.msk.bf16.vlgmr.msra.gmra.mxu3 %vm649_vm2, %v1008_v63 }
 0x290   : > { %v806_v2 = vpop.f32.mrf.mxu3 }
 0x291   : > { %v811_v28 = vmul.f32 0.020408163, %v806_v2 }
 0x293   : > { %v1029_v18 = vmul.f32 %v811_v28, %v811_v28 }
 0x298   : > { %v808_v3 = vpop.f32.mrf.mxu3 }
 0x299   : > { %v2200_v36 = vmul.f32 0.020408163, %v808_v3 }
 0x29b   : > { %v1030_v45 = vmul.f32 %v2200_v36, %v2200_v36 }
 0x2aa   : > { %v856_v9 = vpop.f32.mrf.mxu1 }
 0x2ab   : > { %v861_v31 = vmul.f32 0.020408163, %v856_v9  ;;  %v503_v9 = vmul.f32 %v1523_v55, %v2070_v26 }
 0x2ad   : > { %v1039_v40 = vmul.f32 %v861_v31, %v861_v31  ;;  %v1049_v46 = vmul.f32 %v861_v31, %v811_v28 }
 0x2ae   : > { %v783_v22 = vpop.f32.mrf.mxu2 }
 0x2af   : > { %v788_v17 = vmul.f32 0.020408163, %v783_v22  ;;  %v483_v22 = vsel %vm481_vm11, %v482_v0, %v480_v61 }
 0x2b0   : > { %v831_v4 = vpop.f32.mrf.mxu0  ;;  %v523_v30 = vadd.f32 1e-08, %v483_v22 }
 0x2b1   : > { %v836_v29 = vmul.f32 0.020408163, %v831_v4  ;;  %v1027_v39 = vmul.f32 %v788_v17, %v788_v17  ;;  %v1033_v41 = vmul.f32 2.0, %v788_v17  ;;  %v1053_v47 = vmul.f32 %v861_v31, %v788_v17 }
 0x2b2   : > { %v858_v37 = vpop.f32.mrf.mxu1  ;;  %1526 = vrcp.f32 %v523_v30 }
 0x2b3   : > { %v1037_v19 = vmul.f32 %v836_v29, %v836_v29  ;;  %v1043_v20 = vmul.f32 2.0, %v836_v29  ;;  %v1047_v42 = vmul.f32 %v836_v29, %v788_v17  ;;  %v2204_v44 = vmul.f32 0.020408163, %v858_v37 }
 0x2b4   : > { %v1055_v48 = vmul.f32 %v836_v29, %v811_v28  ;;  %v1031_v50 = vsub.f32 %v1027_v39, %v1029_v18  ;;  %v2216_v57 = vmul.f32 %v1033_v41, %v811_v28  ;;  %v504_v28 = vmul.f32 %v1523_v55, %v503_v9 }
 0x2b5   : > { %v1041_v51 = vsub.f32 %v1037_v19, %v1039_v40  ;;  %v2211_v54 = vmul.f32 %v1043_v20, %v861_v31  ;;  %v2218_v15 = vsub.f32 %v1047_v42, %v1049_v46  ;;  %v1040_v60 = vmul.f32 %v2204_v44, %v2204_v44 }
 0x2b6   : > { %v785_v38 = vpop.f32.mrf.mxu2  ;;  %v1050_v62 = vmul.f32 %v2204_v44, %v2200_v36  ;;  %v2228_v63 = vadd.f32 %v1055_v48, %v1053_v47  ;;  %v505_v34 = vmul.f32 0.5, %v504_v28  ;;  %v494_v40 = vsub.f32 1.5, %v493_v33 }
 0x2b7   : > { %v2214_v56 = vmul.f32 0.020408163, %v785_v38  ;;  %v1059_v5 = vadd.f32 %v1041_v51, %v1031_v50  ;;  %v2234_v8 = vadd.f32 %v2211_v54, %v2216_v57  ;;  %v2240_v21 = vmul.f32 2.0, %v2218_v15 }
 0x2b8   : > { %v833_v23 = vpop.f32.mrf.mxu0  ;;  %v2251_v18 = vmul.f32 2.0, %v2228_v63  ;;  %v506_v41 = vsub.f32 1.5, %v505_v34 }
 0x2b9   : > { %v2220_v59 = vmul.f32 0.020408163, %v833_v23  ;;  %v1028_v12 = vmul.f32 %v2214_v56, %v2214_v56  ;;  %v1034_v4 = vmul.f32 2.0, %v2214_v56  ;;  %v2248_v37 = vadd.f32 0.0001, %v1059_v5 }
 0x2ba   : > { %v507_v47 = vmul.f32 %v1523_v55, %v506_v41  ;;  %v512_v55 = vand.u32 2147483648, %v2070_v26 }
 0x2bb   : > { %v1038_v25 = vmul.f32 %v2220_v59, %v2220_v59  ;;  %v1044_v29 = vmul.f32 2.0, %v2220_v59  ;;  %v1048_v31 = vmul.f32 %v2220_v59, %v2214_v56  ;;  %v1032_v39 = vsub.f32 %v1028_v12, %v1030_v45 }
 0x2bc   : > { %v2254_v20 = vmul.f32 %v1034_v4, %v2200_v36  ;;  %v495_v45 = vmul.f32 %v1521_v49, %v494_v40 }
 0x2bd   : > { %v1042_v19 = vsub.f32 %v1038_v25, %v1040_v60  ;;  %v2257_v23 = vmul.f32 %v1044_v29, %v2204_v44  ;;  %v2259_v46 = vsub.f32 %v1048_v31, %v1050_v62  ;;  %v1525_v60 = vpop.eup %1524 }
 0x2be   : > { %v881_v2 = vpop.f32.mrf.mxu2  ;;  %v496_v1 = vmul.f32 %v495_v45, %v2035_v16  ;;  %v526_v22 = vmul.f32 %v1525_v60, %v522_v10 }
 0x2bf   : > { %v886_v11 = vmul.f32 0.020408163, %v881_v2  ;;  %v508_v2 = vmul.f32 %v507_v47, %v2070_v26  ;;  %v1060_v25 = vadd.f32 %v1042_v19, %v1032_v39 }
 0x2c0   : > { %v931_v13 = vpop.f32.mrf.mxu0  ;;  %v498_v12 = vsel %vm497_vm12, %v2035_v16, %v496_v1  ;;  %v528_v33 = vsub.f32 2.0, %v526_v22 }
 0x2c1   : > { %v1065_v3 = vsub.f32 %v886_v11, %v1031_v50  ;;  %v936_v17 = vmul.f32 0.020408163, %v931_v13  ;;  %v1527_v13 = vpop.eup %1526  ;;  %v510_v14 = vsel %vm509_vm14, %v2070_v26, %v508_v2  ;;  %v501_v10 = vsel %vm499_vm13, %v500_v58, %v498_v12 }
 0x2c2   : > { %v527_v31 = vmul.f32 %v1527_v13, %v523_v30  ;;  %v513_v40 = vsel %vm511_vm15, %v512_v55, %v510_v14  ;;  %v542_v16 = vmul.f32 2.0, %v501_v10  ;;  %v1062_v58 = vadd.f32 0.0001, %v1060_v25 }
 0x2c3   : > { %v1073_v38 = vsub.f32 %v936_v17, %v1041_v51  ;;  %v1067_v42 = vmul.f32 1.0208334, %v1065_v3  ;;  %v538_v17 = vadd.f32 %v2103_v53, %v2099_v52  ;;  %v543_v45 = vmul.f32 2.0, %v513_v40 }
 0x2c4   : > { %v529_v52 = vsub.f32 2.0, %v527_v31 }
 0x2c5   : > { %v1075_v43 = vmul.f32 1.0208334, %v1073_v38  ;;  %vm540_vm0 = vcmp.lt.f32.partialorder %v538_v17, 0.0 }
 0x2c6   : > { %v883_v24 = vpop.f32.mrf.mxu2  ;;  %v906_v27 = vpop.f32.mrf.mxu3 }
 0x2c7   : > { %v1081_v48 = vadd.f32 %v1075_v43, %v1067_v42  ;;  %v887_v50 = vmul.f32 0.020408163, %v883_v24  ;;  %v911_v51 = vmul.f32 0.020408163, %v906_v27  ;;  %v530_v43 = vmul.f32 %v1525_v60, %v528_v33 }
 0x2c8   : > { %v933_v61 = vpop.f32.mrf.mxu0  ;;  %v956_v0 = vpop.f32.mrf.mxu1 }
 0x2c9   : > { %v1083_v49 = vadd.f32 0.0009, %v1081_v48  ;;  %v1066_v62 = vsub.f32 %v887_v50, %v1032_v39  ;;  %v937_v5 = vmul.f32 0.020408163, %v933_v61  ;;  %v1069_v9 = vsub.f32 %v911_v51, %v2216_v57 }
 0x2ca   : > { %v961_v11 = vmul.f32 0.020408163, %v956_v0  ;;  %v539_v57 = vadd.f32 %v2123_v7, %v2119_v6  ;;  %v531_v50 = vmul.f32 %v1527_v13, %v529_v52  ;;  %v532_v51 = vmul.f32 %v530_v43, %v2198_v35 }
 0x2cb   : > { %v1074_v4 = vsub.f32 %v937_v5, %v1042_v19  ;;  %v1068_v28 = vmul.f32 1.0208334, %v1066_v62  ;;  %v1087_v34 = vmul.f32 %v1083_v49, %v2248_v37  ;;  %v1071_v38 = vmul.f32 1.0208334, %v1069_v9 }
 0x2cc   : > { %v1077_v3 = vsub.f32 %v961_v11, %v2211_v54  ;;  %v1095_v6 = vmul.f32 %v1083_v49, %v2234_v8  ;;  %v1064_v0 = vadd.f32 %v2257_v23, %v2254_v20  ;;  %v533_v49 = vmul.f32 %v531_v50, %v2191_v32 }
 0x2cd   : > { %v1076_v29 = vmul.f32 1.0208334, %v1074_v4  ;;  %vm541_vm2 = vcmp.lt.f32.partialorder %v539_v57, 0.0  ;;  %v544_v62 = vsub.f32 %v542_v16, %v532_v51 }
 0x2ce   : > { %v1079_v39 = vmul.f32 1.0208334, %v1077_v3  ;;  %v908_v26 = vpop.f32.mrf.mxu3  ;;  %v997_v19 = vpop.f32.mrf.mxu2 }
 0x2cf   : > { %v1082_v54 = vadd.f32 %v1076_v29, %v1068_v28  ;;  %v912_v41 = vmul.f32 0.020408163, %v908_v26  ;;  %v1002_v42 = vmul.f32 0.020408163, %v997_v19  ;;  %v546_v13 = vsel %vm540_vm0, %v544_v62, %v532_v51 }
 0x2d0   : > { %v1085_v53 = vadd.f32 %v1079_v39, %v1071_v38  ;;  %v958_v7 = vpop.f32.mrf.mxu1  ;;  %v1056_v29 = vmul.f32 %v2220_v59, %v2200_v36  ;;  %v549_v10 = vsel %vm548_vm1, %v546_v13, 0.0  ;;  %v1115_v39 = vadd.f32 0.0001, %v2240_v21 }
 0x2d1   : > { %v1084_v24 = vadd.f32 0.0009, %v1082_v54  ;;  %v1070_v30 = vsub.f32 %v912_v41, %v2254_v20  ;;  %v962_v27 = vmul.f32 0.020408163, %v958_v7  ;;  %v1119_v61 = vsub.f32 %v1002_v42, %v2218_v15 }
 0x2d2   : > { %v1089_v47 = vmul.f32 %v1085_v53, %v2234_v8  ;;  %v1093_v48 = vmul.f32 %v1085_v53, %v2248_v37  ;;  %v545_v15 = vsub.f32 %v543_v45, %v533_v49  ;;  %v1054_v36 = vmul.f32 %v2204_v44, %v2214_v56 }
 0x2d3   : > { %v1078_v60 = vsub.f32 %v962_v27, %v2257_v23  ;;  %v1072_v8 = vmul.f32 1.0208334, %v1070_v30  ;;  %v1088_v35 = vmul.f32 %v1084_v24, %v1062_v58  ;;  %v1121_v9 = vmul.f32 2.0416667, %v1119_v61 }
 0x2d4   : > { %v2291_v1 = vsub.f32 %v1087_v34, %v1089_v47  ;;  %v2293_v2 = vadd.f32 %v1095_v6, %v1093_v48  ;;  %v1096_v32 = vmul.f32 %v1084_v24, %v1064_v0  ;;  %v547_v25 = vsel %vm541_vm2, %v545_v15, %v533_v49 }
 0x2d5   : > { %v1080_v37 = vmul.f32 1.0208334, %v1078_v60  ;;  %v550_v31 = vsel %vm548_vm1, %v547_v25, 0.0  ;;  %v1123_v33 = vadd.f32 0.0009, %v1121_v9  ;;  %v1114_v59 = vmul.f32 2.0, %v2259_v46 }
 0x2d6   : > { %v999_v5 = vpop.f32.mrf.mxu2  ;;  %v1020_v55 = vpop.f32.mrf.mxu3  ;;  %v1099_v20 = vmul.f32 %v2291_v1, %v2291_v1  ;;  %v1101_v23 = vmul.f32 %v2293_v2, %v2293_v2  ;;  %v551_v19 = vadd.f32 %v550_v31, %v549_v10  ;;  %v1058_v6 = vadd.f32 %v1056_v29, %v1054_v36 }
 0x2d7   : > { %v1086_v11 = vadd.f32 %v1080_v37, %v1072_v8  ;;  %v1003_v12 = vmul.f32 0.020408163, %v999_v5  ;;  %v1025_v22 = vmul.f32 0.020408163, %v1020_v55  ;;  %v1129_v52 = vmul.f32 %v1123_v33, %v1115_v39 }
 0x2d8   : > { %v1103_v4 = vadd.f32 %v1101_v23, %v1099_v20  ;;  %552 = vadd.xlane.f32.xlu2 %v551_v19  ;;  %v1137_v21 = vmul.f32 %v1123_v33, %v2251_v18  ;;  %v1116_v27 = vadd.f32 0.0001, %v1114_v59  ;;  %v1118_v44 = vmul.f32 2.0, %v1058_v6 }
 0x2d9   : > { %v1090_v14 = vmul.f32 %v1086_v11, %v1064_v0  ;;  %v1094_v28 = vmul.f32 %v1086_v11, %v1062_v58  ;;  %v1120_v3 = vsub.f32 %v1003_v12, %v2259_v46  ;;  %v1125_v57 = vsub.f32 %v1025_v22, %v2228_v63 }
 0x2da   : > { %1528 = vrcp.f32 %v1103_v4  ;;  %vm1149_vm1 = vcmask 80896  }
 0x2db   : > { %v1092_v34 = vsub.f32 %v1088_v35, %v1090_v14  ;;  %v1098_v17 = vadd.f32 %v1096_v32, %v1094_v28  ;;  %v1127_v38 = vmul.f32 2.0416667, %v1125_v57  ;;  %v1122_v26 = vmul.f32 2.0416667, %v1120_v3 }
 0x2dd   : > { %v1100_v40 = vmul.f32 %v1092_v34, %v1092_v34  ;;  %v1102_v54 = vmul.f32 %v1098_v17, %v1098_v17  ;;  %v1131_v63 = vmul.f32 %v1127_v38, %v2251_v18  ;;  %v1135_v41 = vmul.f32 %v1127_v38, %v1115_v39 }
 0x2de   : > { %v1022_v42 = vpop.f32.mrf.mxu3  ;;  %v1124_v43 = vadd.f32 0.0009, %v1122_v26 }
 0x2df   : > { %v1026_v53 = vmul.f32 0.020408163, %v1022_v42  ;;  %v1104_v16 = vadd.f32 %v1102_v54, %v1100_v40  ;;  %v1133_v24 = vsub.f32 %v1129_v52, %v1131_v63  ;;  %v1139_v45 = vadd.f32 %v1137_v21, %v1135_v41  ;;  %v1183_v21 = vld [vmem:[#allocation2] sm:$0x1] }
 0x2e0   : > { %v1529_v7 = vpop.eup %1528  ;;  %v1130_v46 = vmul.f32 %v1124_v43, %v1116_v27  ;;  %v1138_v51 = vmul.f32 %v1124_v43, %v1118_v44 }
 0x2e1   : > { %v1126_v30 = vsub.f32 %v1026_v53, %v1058_v6  ;;  %1530 = vrcp.f32 %v1104_v16  ;;  %v1107_v47 = vmul.f32 %v1529_v7, %v1103_v4  ;;  %v1165_v58 = vmul.f32 %v1133_v24, %v2293_v2 }
 0x2e2   : > { %v1163_v0 = vmul.f32 %v1139_v45, %v2291_v1  ;;  %v1141_v18 = vmul.f32 %v1133_v24, %v2291_v1  ;;  %v1143_v60 = vmul.f32 %v1139_v45, %v2293_v2 }
 0x2e3   : > { %v1128_v56 = vmul.f32 2.0416667, %v1126_v30  ;;  %v1109_v61 = vsub.f32 2.0, %v1107_v47  ;;  %v1188_v30 = vld [vmem:[#allocation3] sm:$0x1] }
 0x2e4   : > { %v1167_v23 = vsub.f32 %v1163_v0, %v1165_v58  ;;  %v1145_v9 = vadd.f32 %v1143_v60, %v1141_v18 }
 0x2e5   : > { %v1132_v48 = vmul.f32 %v1128_v56, %v1118_v44  ;;  %v1136_v50 = vmul.f32 %v1128_v56, %v1116_v27  ;;  %v1111_v20 = vmul.f32 %v1529_v7, %v1109_v61  ;;  %v1192_v27 = vld [vmem:[#allocation4] sm:$0x1] }
 0x2e7   : > { %v1134_v49 = vsub.f32 %v1130_v46, %v1132_v48  ;;  %v1140_v8 = vadd.f32 %v1138_v51, %v1136_v50  ;;  %v1531_v37 = vpop.eup %1530  ;;  %v1169_v13 = vmul.f32 %v1167_v23, %v1111_v20  ;;  %v1147_v25 = vmul.f32 %v1145_v9, %v1111_v20 }
 0x2e8   : > { %v1108_v15 = vmul.f32 %v1531_v37, %v1104_v16 }
 0x2e9   : > { %v1142_v62 = vmul.f32 %v1134_v49, %v1092_v34  ;;  %v1144_v35 = vmul.f32 %v1140_v8, %v1098_v17  ;;  %v1164_v5 = vmul.f32 %v1140_v8, %v1092_v34  ;;  %v1166_v55 = vmul.f32 %v1134_v49, %v1098_v17 }
 0x2ea   : > { %v1110_v11 = vsub.f32 2.0, %v1108_v15  ;;  %v1171_v4 = vsel %vm1149_vm1, %v1169_v13, 0.0  ;;  %v1150_v28 = vsel %vm1149_vm1, %v1147_v25, 0.0 }
 0x2eb   : > { %v1168_v12 = vsub.f32 %v1164_v5, %v1166_v55  ;;  %v1146_v22 = vadd.f32 %v1144_v35, %v1142_v62 }
 0x2ec   : > { %v1112_v32 = vmul.f32 %v1531_v37, %v1110_v11 }
 0x2ee   : > { %v1170_v1 = vmul.f32 %v1168_v12, %v1112_v32  ;;  %v1148_v2 = vmul.f32 %v1146_v22, %v1112_v32 }
 0x2f0   : > { %v1172_v14 = vsel %vm1151_vm3, %v1170_v1, 0.0  ;;  %v1152_v3 = vsel %vm1151_vm3, %v1148_v2, 0.0 }
 0x2f1   : > { %v1173_v57 = vadd.f32 %v1172_v14, %v1171_v4  ;;  %v1153_v29 = vadd.f32 %v1152_v3, %v1150_v28 }
 0x2f3   : > { %1174 = vadd.xlane.f32.xlu1 %v1173_v57  ;;  %1154 = vadd.xlane.f32.xlu0 %v1153_v29 }
 0x34b   : > { %v553_v10 = vpop.xlane.xlu2 %552 }
 0x34c   : > { %v554_v31 = vrot.slane %v553_v10, 4 }
 0x34e   : > { %v555_v33 = vadd.f32 %v554_v31, %v553_v10 }
 0x350   : > { %v556_v34 = vrot.slane %v555_v33, 2 }
 0x352   : > { %v557_v17 = vadd.f32 %v556_v34, %v555_v33 }
 0x354   : > { %v558_v38 = vrot.slane %v557_v17, 1 }
 0x356   : > { %v559_v39 = vadd.f32 %v558_v38, %v557_v17 }
 0x358   : > { %1430 = vpush %v559_v39 }
 0x366   : > { %v1175_v26 = vpop.xlane.xlu1 %1174  ;;  %v1155_v19 = vpop.xlane.xlu0 %1154 }
 0x367   : > { %v1176_v40 = vrot.slane %v1175_v26, 4  ;;  %v1156_v54 = vrot.slane %v1155_v19, 4 }
 0x369   : > { %v1177_v63 = vadd.f32 %v1176_v40, %v1175_v26  ;;  %v1157_v36 = vadd.f32 %v1156_v54, %v1155_v19 }
 0x36b   : > { %v1178_v59 = vrot.slane %v1177_v63, 2  ;;  %v1158_v41 = vrot.slane %v1157_v36, 2 }
 0x36d   : > { %v1179_v42 = vadd.f32 %v1178_v59, %v1177_v63  ;;  %v1159_v52 = vadd.f32 %v1158_v41, %v1157_v36 }
 0x36f   : > { %v1160_v53 = vrot.slane %v1159_v52, 1  ;;  %v1180_v6 = vrot.slane %v1179_v42, 1 }
 0x371   : > { %v1161_v7 = vadd.f32 %v1160_v53, %v1159_v52  ;;  %v1181_v43 = vadd.f32 %v1180_v6, %v1179_v42 }
 0x373   : > { %1432 = vpush %v1161_v7 }
 0x374   : > { %1434 = vpush %v1181_v43 }
 0x389   : > { %s1431_s1 = spop %1430 }
 0x38a   : > { %v1184_v16 = vstv %s1431_s1 }
 0x38b   : > { %v1185_v24 = vadd.f32 %v1184_v16, %v1183_v21 }
 0x38d   : > { %1187 = vst.msk [vmem:[#allocation2] sm:$0x1] %vm1186_vm4, %v1185_v24 }
 0x3a4   : > { %s1433_s19 = spop %1432 }
 0x3a5   : > { %v1189_v45 = vstv %s1433_s19  ;;  %s1435_s20 = spop %1434  ;;  %1199 = sbr.rel (%p1416_p7) target bundleno = 955 (0x3bb), region = 72 }
 0x3a6   : > { %v1190_v47 = vadd.f32 %v1189_v45, %v1188_v30  ;;  %v1193_v44 = vstv %s1435_s20 }
 0x3a7   : > { %v1194_v56 = vadd.f32 %v1193_v44, %v1192_v27 }
 0x3a8   : > { %1191 = vst.msk [vmem:[#allocation3] sm:$0x1] %vm1186_vm4, %v1190_v47 }
 0x3a9   : > { %1195 = vst.msk [vmem:[#allocation4] sm:$0x1] %vm1186_vm4, %v1194_v56 }
 0x3aa   : > { %v1203_v50 = vld [vmem:[#allocation2] sm:$0x1]  ;;  %v1213_v8 = vstv %s1202_s15  ;;  %v1216_v62 = vstv %s1215_s10 }
 0x3ab   : > { %v1204_v18 = vmul.f32 0.001953125, %v1203_v50 }
 0x3ad   : > { %v1214_v37 = vmul.f32 %v1213_v8, %v1204_v18 }
 0x3af   : > { %v1205_v46 = vld [vmem:[#allocation3] sm:$0x1] }
 0x3b0   : > { %v1207_v48 = vld [vmem:[#allocation4] sm:$0x1]  ;;  %v1206_v51 = vmul.f32 0.005, %v1205_v46 }
 0x3b1   : > { %v1208_v58 = vmul.f32 0.005, %v1207_v48 }
 0x3b2   : > { %v1209_v61 = vsub.f32 1.0, %v1206_v51 }
 0x3b3   : > { %v1211_v0 = vsub.f32 0.0, %v1208_v58 }
 0x3b4   : > { %v1210_v60 = vmul.f32 0.5, %v1209_v61 }
 0x3b5   : > { %v1212_v49 = vmul.f32 0.5, %v1211_v0 }
 0x3b6   : > { %v1217_v35 = vmul.f32 %v1216_v62, %v1210_v60 }
 0x3b7   : > { %v1220_v5 = vmul.f32 %v1216_v62, %v1212_v49 }
 0x3b8   : > { %v1218_v55 = vadd.f32 %v1217_v35, %v1214_v37 }
 0x3b9   : > { %1221 = vst.msk [vmem:[#allocation15] sm:$0x1] %vm1186_vm4, %v1220_v5 }
 0x3ba   : > { %1219 = vst.msk [vmem:[#allocation14] sm:$0x1] %vm1186_vm4, %v1218_v55 }
 0x3bb PF: > { %p1466_p10 = scmp.eq.s32.totalorder %s1841_s0, 1  ;;  %s1772_s29 = smov [#allocation14]  }
 0x3bc   : > { %s1228_s9 = sshll.u32 %s1772_s29, 4  ;;  %s1230_s2 = sshll.u32 %s2362_s7, 4  ;;  %s1229_s9 = int_to_ptr.vmem [resolvable:$true] %s1228_s9  ;;  %s1231_s2 = int_to_ptr.hbm [resolvable:$true] %s1230_s2 }
 0x3bd   : > { %1445 = dma.vmem_to_hbm [thread:$0]  (%p1466_p10), %s1229_s9, 16, %s1231_s2, [#allocation8]  }
 0x3be   : > { %s1242_s24 = sshll.u32 %s2363_s8, 4  ;;  %s1773_s14 = smov [#allocation15]   ;;  %s1243_s24 = int_to_ptr.hbm [resolvable:$true] %s1242_s24 }
 0x3bf   : > { %s1240_s18 = sshll.u32 %s1773_s14, 4  ;;  %s1241_s18 = int_to_ptr.vmem [resolvable:$true] %s1240_s18 }
 0x3c0   : > { %1447 = dma.vmem_to_hbm [thread:$0]  (%p1466_p10), %s1241_s18, 16, %s1243_s24, [#allocation16]  }
 0x3c1   : > { %1737 = dma.done.wait (%p1466_p10), [#allocation8], 16  }
 0x3c2   : > { %1739 = vsyncadd (%p1466_p10), [#allocation8], 4294967280 }
 0x3c3   : > { %1741 = dma.done.wait (%p1466_p10), [#allocation16], 16  }
 0x3c4   : > { %1743 = vsyncadd (%p1466_p10), [#allocation16], 4294967280 }
 0x3c5 PF: > { %s2374_s16 = sld [smem:[#allocation22_spill]]  ;;  %p28_p5 = scmp.ge.s32.totalorder %s1844_s11, 4  }
 0x3c6   : > { %s2375_s9 = sld [smem:[#allocation23_spill]]  ;;  %s2376_s29 = smov %s1750_s30 }
 0x3c7   : > { %s2378_s10 = smov %s1844_s11  ;;  %30 = sbr.rel (!%p28_p5) target bundleno = 13 (0xd), region = 138 }
 0x3cb   : > { %s2377_s30 = smov %s2374_s16 }
 0x3cc   :  { %1261 = vsyncpa [#allocation7], 1 }
 0x3cd   :  { %1263 = vsyncpa [#allocation7 + $0x1], 1 }
 0x3ce   :  { %1264 = vsyncpa [#allocation10], 1 }
 0x3cf   :  { %1266 = vsyncpa [#allocation10 + $0x1], 1 }
 0x3d0   :  { %1267 = vsyncpa [#allocation13], 1 }
 0x3d1   :  { %1269 = vsyncpa [#allocation13 + $0x1], 1 }
 0x3d2   :  { %1270 = vsyncpa [#allocation8], 1 }
 0x3d3   :  { %1272 = vsyncpa [#allocation8 + $0x1], 1 }
 0x3d4   :  { %1273 = vsyncpa [#allocation16], 1 }

</bundles_post_ra>
